<compile_context>
chip_gen: v6e
topology: v6e:2x2x1
jax: 0.10.0
libtpu: 0.0.40
codegen_flags: <defaults>
</compile_context>

<pallas_src>
import functools
import math

import jax
import jax.numpy as jnp
from jax import lax
from jax.experimental import pallas as pl
from jax.experimental.pallas import tpu as pltpu

_MXU_DTYPE = jnp.bfloat16   # dot-operand dtype; accumulation stays f32


def _lstm_seq_kernel(gx_ref, whh_ref, out_ref, hn_ref, cn_ref,
                     h_scr, c_scr, *, seq_len, activation, mxu_dtype):
    """Whole-sequence LSTM recurrence (single internal layer).

    gx_ref : (T, 4, B, H) f32   precomputed x_t @ W_ih^T + (b_ih + b_hh), per gate
    whh_ref: (4, H, H)   bf16   per-gate recurrent weights, already transposed
    out_ref: (T, B, H)   f32    sequence output (hidden_activation applied)
    hn_ref : (B, H)      f32    final hidden state
    cn_ref : (B, H)      f32    final cell state
    h_scr, c_scr: (B, H) f32    VMEM carries
    """
    h_scr[...] = jnp.zeros_like(h_scr)
    c_scr[...] = jnp.zeros_like(c_scr)

    def step(t, carry):
        h_prev = h_scr[...]
        c_prev = c_scr[...]
        h_b = h_prev.astype(mxu_dtype)

        # Per-gate recurrent matmuls; gate index is a leading dim -> no
        # lane-offset slicing.  PyTorch gate order [i, f, g, o].
        gh_i = jnp.dot(h_b, whh_ref[0], preferred_element_type=jnp.float32)
        gh_f = jnp.dot(h_b, whh_ref[1], preferred_element_type=jnp.float32)
        gh_g = jnp.dot(h_b, whh_ref[2], preferred_element_type=jnp.float32)
        gh_o = jnp.dot(h_b, whh_ref[3], preferred_element_type=jnp.float32)

        gx = gx_ref[t]                      # (4, B, H), dynamic leading index
        i_g = jax.nn.sigmoid(gx[0] + gh_i)
        f_g = jax.nn.sigmoid(gx[1] + gh_f)
        g_g = jnp.tanh(gx[2] + gh_g)
        o_g = jax.nn.sigmoid(gx[3] + gh_o)

        c_new = f_g * c_prev + i_g * g_g
        h_new = o_g * jnp.tanh(c_new)

        h_scr[...] = h_new
        c_scr[...] = c_new

        # hidden_activation is applied to the sequence output only (NOT to
        # the recurrent state h/c, matching the PyTorch module).
        if activation == "tanh":
            out_ref[t] = jnp.tanh(h_new)
        elif activation == "relu":
            out_ref[t] = jnp.maximum(h_new, 0.0)
        else:  # "none"
            out_ref[t] = h_new
        return carry

    lax.fori_loop(0, seq_len, step, 0, unroll=(seq_len <= 16))

    hn_ref[...] = h_scr[...]
    cn_ref[...] = c_scr[...]


def lstm_single_layer(gates_x, w_hh_gates, activation):
    """Run one internal LSTM layer over a full sequence.

    gates_x:    (T, 4, B, H) float32  precomputed input projection + bias.
    w_hh_gates: (4, H, H)    bf16     per-gate W_hh^T.
    Returns (out_tm (T,B,H), h_n (B,H), c_n (B,H)), all float32.
    """
    T, _, B, H = gates_x.shape

    kernel = functools.partial(_lstm_seq_kernel, seq_len=T,
                               activation=activation, mxu_dtype=_MXU_DTYPE)

    out_tm, h_n, c_n = pl.pallas_call(
        kernel,
        out_shape=(
            jax.ShapeDtypeStruct((T, B, H), jnp.float32),
            jax.ShapeDtypeStruct((B, H), jnp.float32),
            jax.ShapeDtypeStruct((B, H), jnp.float32),
        ),
        grid_spec=pltpu.PrefetchScalarGridSpec(
            num_scalar_prefetch=0,
            grid=(1,),
            in_specs=[
                pl.BlockSpec((T, 4, B, H), lambda i: (0, 0, 0, 0)),  # gates_x
                pl.BlockSpec((4, H, H), lambda i: (0, 0, 0)),        # W_hh^T
            ],
            out_specs=(
                pl.BlockSpec((T, B, H), lambda i: (0, 0, 0)),  # seq out (bulk)
                pl.BlockSpec((B, H), lambda i: (0, 0)),        # h_n
                pl.BlockSpec((B, H), lambda i: (0, 0)),        # c_n
            ),
            scratch_shapes=[
                pltpu.VMEM((B, H), jnp.float32),   # h carry
                pltpu.VMEM((B, H), jnp.float32),   # c carry
            ],
        ),
        compiler_params=pltpu.CompilerParams(
            dimension_semantics=("arbitrary",)),
    )(gates_x, w_hh_gates)
    return out_tm, h_n, c_n


def _input_projection(x, w_ih_gates, bias_gates, batch_first):
    """Precompute gates_x for the whole sequence in one MXU-friendly einsum.

    x: (B, T, F) if batch_first else (T, B, F), any float dtype.
    w_ih_gates: (4, H, F) bf16;  bias_gates: (4, H) f32 (= b_ih + b_hh).
    Returns (T, 4, B, H) float32.  Fuses the batch-first -> time-major
    transpose into the projection (no separate transpose pass).
    """
    eq = 'btf,ghf->tgbh' if batch_first else 'tbf,ghf->tgbh'
    gx = jnp.einsum(eq, x.astype(_MXU_DTYPE), w_ih_gates,
                    preferred_element_type=jnp.float32)
    return gx + bias_gates[None, :, None, :]


class EncoderPallas:
    """JAX/Pallas port of the PyTorch Encoder module (eval mode)."""

    def __init__(self, n_features, n_samples, hidden_neurons,
                 hidden_activation, dropout_rate, n_layers, key):
        self.n_features = n_features
        self.n_samples = n_samples
        self.n_layers = n_layers
        self.hidden_neurons = hidden_neurons
        self.hidden_activation = hidden_activation   # "tanh" | "relu" | "none"
        self.dropout_rate = dropout_rate

        # Replicate the ModuleList construction logic of the PyTorch __init__.
        sizes = [(n_features, hidden_neurons[0])]
        last_h = hidden_neurons[0]
        for i in range(1, int((len(hidden_neurons) + 1) / 2)):
            sizes.append((last_h, hidden_neurons[i]))
            last_h = hidden_neurons[i]

        # Deterministic PyTorch-style init: U(-1/sqrt(H), 1/sqrt(H)).
        # Stored pre-packed for the kernels:
        #   w_ih_gates (4,H,IN) bf16, w_hh_gates (4,H_in,H_out) bf16,
        #   bias_gates (4,H) f32 (= b_ih + b_hh).
        self.rnn_params = []   # per nn.LSTM module: list over internal layers
        for (in_sz, hid) in sizes:
            layers = []
            for l in range(n_layers):
                layer_in = in_sz if l == 0 else hid
                k = 1.0 / math.sqrt(hid)
                key, k1, k2, k3, k4 = jax.random.split(key, 5)
                w_ih = jax.random.uniform(k1, (4 * hid, layer_in),
                                          jnp.float32, -k, k)
                w_hh = jax.random.uniform(k2, (4 * hid, hid),
                                          jnp.float32, -k, k)
                b_ih = jax.random.uniform(k3, (4 * hid,), jnp.float32, -k, k)
                b_hh = jax.random.uniform(k4, (4 * hid,), jnp.float32, -k, k)

                w_ih_g = w_ih.reshape(4, hid, layer_in).astype(_MXU_DTYPE)
                # per-gate W_hh^T : (4, H_in, H_out)
                w_hh_g = jnp.transpose(w_hh.reshape(4, hid, hid),
                                       (0, 2, 1)).astype(_MXU_DTYPE)
                bias_g = (b_ih + b_hh).reshape(4, hid).astype(jnp.float32)
                layers.append((w_ih_g, w_hh_g, bias_g))
            self.rnn_params.append(layers)

    def _run_lstm_module(self, x, layers, batch_first):
        """One nn.LSTM (possibly stacked num_layers) + hidden_activation."""
        h_ns, c_ns = [], []
        n = len(layers)
        for l, (w_ih_g, w_hh_g, bias_g) in enumerate(layers):
            # Activation applies only to the top internal layer's output
            # (the module applies it after nn.LSTM returns).
            act = self.hidden_activation if l == n - 1 else "none"
            gates_x = _input_projection(x, w_ih_g, bias_g, batch_first)
            x, h_n, c_n = lstm_single_layer(gates_x, w_hh_g, act)
            batch_first = False            # kernel output is time-major
            h_ns.append(h_n)
            c_ns.append(c_n)
        hidden = (jnp.stack(h_ns, axis=0), jnp.stack(c_ns, axis=0))
        return x, hidden

    def __call__(self, w):
        batch_size = w.shape[0]
        w = w.reshape((batch_size, self.n_samples, self.n_features))
        x = w                       # batch-first; transpose fused into 1st einsum
        batch_first = True
        hidden = None
        for layers in self.rnn_params:
            x, hidden = self._run_lstm_module(x, layers, batch_first)
            batch_first = False
            # dropout (eval) -> identity
        out = jnp.transpose(x, (1, 0, 2))   # (B, T, H) batch-first, final only
        return out, hidden


if __name__ == "__main__":
    # Small, deterministic example consistent with the module's forward:
    batch = 2
    n_features = 4
    n_samples = 8
    hidden_neurons = [32, 16, 8]   # -> two LSTM modules: 4->32, 32->16
    n_layers = 1

    key = jax.random.PRNGKey(0)
    key, xk, pk = jax.random.split(key, 3)

    enc = EncoderPallas(n_features, n_samples, hidden_neurons,
                        hidden_activation="tanh", dropout_rate=0.0,
                        n_layers=n_layers, key=pk)

    # Input can be flat; forward reshapes to (batch, n_samples, n_features).
    x = jax.random.normal(xk, (batch, n_samples * n_features), jnp.float32)

    out, (h_n, c_n) = enc(x)
    out = jax.block_until_ready(out)
    h_n = jax.block_until_ready(h_n)
    c_n = jax.block_until_ready(c_n)

    assert out.shape == (batch, n_samples, hidden_neurons[1])
    assert h_n.shape == (n_layers, batch, hidden_neurons[1])
    assert c_n.shape == (n_layers, batch, hidden_neurons[1])
    assert bool(jnp.all(jnp.isfinite(out)))

    print("KERNEL_OK")
</pallas_src>

<mosaic_0001>
module attributes {stable_mosaic.version = 11 : i64} {
  func.func @_lstm_seq_kernel(%arg0: i32, %arg1: memref<8x4x2x32xf32, #tpu.memory_space<vmem>>, %arg2: memref<4x32x32xbf16, #tpu.memory_space<vmem>>, %arg3: memref<8x2x32xf32, #tpu.memory_space<vmem>>, %arg4: memref<2x32xf32, #tpu.memory_space<vmem>>, %arg5: memref<2x32xf32, #tpu.memory_space<vmem>>, %arg6: memref<2x32xf32, #tpu.memory_space<vmem>>, %arg7: memref<2x32xf32, #tpu.memory_space<vmem>>) attributes {dimension_semantics = [#tpu.dimension_semantics<arbitrary>], iteration_bounds = array<i64: 1>, scalar_prefetch = 0 : i64, scratch_operands = 2 : i64, tpu.core_type = #tpu.core_type<tc>, window_params = [{pipeline_mode = #tpu.pipeline_mode<synchronous>, transform_indices = @transform_0, window_bounds = array<i64: 8, 4, 2, 32>}, {pipeline_mode = #tpu.pipeline_mode<synchronous>, transform_indices = @transform_1, window_bounds = array<i64: 4, 32, 32>}, {pipeline_mode = #tpu.pipeline_mode<synchronous>, transform_indices = @transform_2, window_bounds = array<i64: 8, 2, 32>}, {pipeline_mode = #tpu.pipeline_mode<synchronous>, transform_indices = @transform_3, window_bounds = array<i64: 2, 32>}, {pipeline_mode = #tpu.pipeline_mode<synchronous>, transform_indices = @transform_4, window_bounds = array<i64: 2, 32>}]} {
    %cst = arith.constant 0.000000e+00 : f32
    %0 = vector.broadcast %cst : f32 to vector<2x32xf32>
    %c0 = arith.constant 0 : index
    %c0_0 = arith.constant 0 : index
    %1 = vector.load %arg6[%c0, %c0_0] : memref<2x32xf32, #tpu.memory_space<vmem>>, vector<2x32xf32>
    tpu.vector_store %arg6[%c0, %c0_0], %0 {strides = array<i32>} : memref<2x32xf32, #tpu.memory_space<vmem>>, vector<2x32xf32>,
    %cst_1 = arith.constant 0.000000e+00 : f32
    %2 = vector.broadcast %cst_1 : f32 to vector<2x32xf32>
    %c0_2 = arith.constant 0 : index
    %c0_3 = arith.constant 0 : index
    %3 = vector.load %arg7[%c0_2, %c0_3] : memref<2x32xf32, #tpu.memory_space<vmem>>, vector<2x32xf32>
    tpu.vector_store %arg7[%c0_2, %c0_3], %2 {strides = array<i32>} : memref<2x32xf32, #tpu.memory_space<vmem>>, vector<2x32xf32>,
    %c0_i32 = arith.constant 0 : i32
    %c0_4 = arith.constant 0 : index
    %c0_5 = arith.constant 0 : index
    %4 = vector.load %arg6[%c0_4, %c0_5] : memref<2x32xf32, #tpu.memory_space<vmem>>, vector<2x32xf32>
    %c0_6 = arith.constant 0 : index
    %c0_7 = arith.constant 0 : index
    %5 = vector.load %arg7[%c0_6, %c0_7] : memref<2x32xf32, #tpu.memory_space<vmem>>, vector<2x32xf32>
    %6 = arith.truncf %4 : vector<2x32xf32> to vector<2x32xbf16>
    %c0_8 = arith.constant 0 : index
    %c0_9 = arith.constant 0 : index
    %c0_10 = arith.constant 0 : index
    %7 = vector.load %arg2[%c0_8, %c0_9, %c0_10] : memref<4x32x32xbf16, #tpu.memory_space<vmem>>, vector<1x32x32xbf16>
    %8 = vector.shape_cast %7 : vector<1x32x32xbf16> to vector<32x32xbf16>
    %cst_11 = arith.constant dense<0.000000e+00> : vector<2x32xf32>
    %9 = tpu.matmul %6, %8, %cst_11 {dimension_numbers = #tpu.dot_dimension_numbers<[1], [0], [0], [1], [0, 0, 1, 1], [], []>} : vector<2x32xbf16>, vector<32x32xbf16>, vector<2x32xf32> -> vector<2x32xf32>
    %c1 = arith.constant 1 : index
    %c0_12 = arith.constant 0 : index
    %c0_13 = arith.constant 0 : index
    %10 = vector.load %arg2[%c1, %c0_12, %c0_13] : memref<4x32x32xbf16, #tpu.memory_space<vmem>>, vector<1x32x32xbf16>
    %11 = vector.shape_cast %10 : vector<1x32x32xbf16> to vector<32x32xbf16>
    %cst_14 = arith.constant dense<0.000000e+00> : vector<2x32xf32>
    %12 = tpu.matmul %6, %11, %cst_14 {dimension_numbers = #tpu.dot_dimension_numbers<[1], [0], [0], [1], [0, 0, 1, 1], [], []>} : vector<2x32xbf16>, vector<32x32xbf16>, vector<2x32xf32> -> vector<2x32xf32>
    %c2 = arith.constant 2 : index
    %c0_15 = arith.constant 0 : index
    %c0_16 = arith.constant 0 : index
    %13 = vector.load %arg2[%c2, %c0_15, %c0_16] : memref<4x32x32xbf16, #tpu.memory_space<vmem>>, vector<1x32x32xbf16>
    %14 = vector.shape_cast %13 : vector<1x32x32xbf16> to vector<32x32xbf16>
    %cst_17 = arith.constant dense<0.000000e+00> : vector<2x32xf32>
    %15 = tpu.matmul %6, %14, %cst_17 {dimension_numbers = #tpu.dot_dimension_numbers<[1], [0], [0], [1], [0, 0, 1, 1], [], []>} : vector<2x32xbf16>, vector<32x32xbf16>, vector<2x32xf32> -> vector<2x32xf32>
    %c3 = arith.constant 3 : index
    %c0_18 = arith.constant 0 : index
    %c0_19 = arith.constant 0 : index
    %16 = vector.load %arg2[%c3, %c0_18, %c0_19] : memref<4x32x32xbf16, #tpu.memory_space<vmem>>, vector<1x32x32xbf16>
    %17 = vector.shape_cast %16 : vector<1x32x32xbf16> to vector<32x32xbf16>
    %cst_20 = arith.constant dense<0.000000e+00> : vector<2x32xf32>
    %18 = tpu.matmul %6, %17, %cst_20 {dimension_numbers = #tpu.dot_dimension_numbers<[1], [0], [0], [1], [0, 0, 1, 1], [], []>} : vector<2x32xbf16>, vector<32x32xbf16>, vector<2x32xf32> -> vector<2x32xf32>
    %19 = arith.index_cast %c0_i32 : i32 to index
    %c0_21 = arith.constant 0 : index
    %c0_22 = arith.constant 0 : index
    %c0_23 = arith.constant 0 : index
    %20 = vector.load %arg1[%19, %c0_21, %c0_22, %c0_23] : memref<8x4x2x32xf32, #tpu.memory_space<vmem>>, vector<1x4x2x32xf32>
    %21 = vector.shape_cast %20 : vector<1x4x2x32xf32> to vector<4x2x32xf32>
    %22 = vector.extract_strided_slice %21 {offsets = [0, 0, 0], sizes = [1, 2, 32], strides = [1, 1, 1]} : vector<4x2x32xf32> to vector<1x2x32xf32>
    %23 = vector.shape_cast %22 : vector<1x2x32xf32> to vector<2x32xf32>
    %24 = arith.addf %23, %9 : vector<2x32xf32>
    %25 = arith.negf %24 : vector<2x32xf32>
    %26 = math.exp %25 : vector<2x32xf32>
    %cst_24 = arith.constant 1.000000e+00 : f32
    %27 = vector.broadcast %cst_24 : f32 to vector<2x32xf32>
    %28 = arith.addf %27, %26 : vector<2x32xf32>
    %29 = arith.divf %27, %28 : vector<2x32xf32>
    %30 = vector.extract_strided_slice %21 {offsets = [1, 0, 0], sizes = [1, 2, 32], strides = [1, 1, 1]} : vector<4x2x32xf32> to vector<1x2x32xf32>
    %31 = vector.shape_cast %30 : vector<1x2x32xf32> to vector<2x32xf32>
    %32 = arith.addf %31, %12 : vector<2x32xf32>
    %33 = arith.negf %32 : vector<2x32xf32>
    %34 = math.exp %33 : vector<2x32xf32>
    %cst_25 = arith.constant 1.000000e+00 : f32
    %35 = vector.broadcast %cst_25 : f32 to vector<2x32xf32>
    %36 = arith.addf %35, %34 : vector<2x32xf32>
    %37 = arith.divf %35, %36 : vector<2x32xf32>
    %38 = vector.extract_strided_slice %21 {offsets = [2, 0, 0], sizes = [1, 2, 32], strides = [1, 1, 1]} : vector<4x2x32xf32> to vector<1x2x32xf32>
    %39 = vector.shape_cast %38 : vector<1x2x32xf32> to vector<2x32xf32>
    %40 = arith.addf %39, %15 : vector<2x32xf32>
    %41 = math.tanh %40 : vector<2x32xf32>
    %42 = vector.extract_strided_slice %21 {offsets = [3, 0, 0], sizes = [1, 2, 32], strides = [1, 1, 1]} : vector<4x2x32xf32> to vector<1x2x32xf32>
    %43 = vector.shape_cast %42 : vector<1x2x32xf32> to vector<2x32xf32>
    %44 = arith.addf %43, %18 : vector<2x32xf32>
    %45 = arith.negf %44 : vector<2x32xf32>
    %46 = math.exp %45 : vector<2x32xf32>
    %cst_26 = arith.constant 1.000000e+00 : f32
    %47 = vector.broadcast %cst_26 : f32 to vector<2x32xf32>
    %48 = arith.addf %47, %46 : vector<2x32xf32>
    %49 = arith.divf %47, %48 : vector<2x32xf32>
    %50 = arith.mulf %37, %5 : vector<2x32xf32>
    %51 = arith.mulf %29, %41 : vector<2x32xf32>
    %52 = arith.addf %50, %51 : vector<2x32xf32>
    %53 = math.tanh %52 : vector<2x32xf32>
    %54 = arith.mulf %49, %53 : vector<2x32xf32>
    %c0_27 = arith.constant 0 : index
    %c0_28 = arith.constant 0 : index
    %55 = vector.load %arg6[%c0_27, %c0_28] : memref<2x32xf32, #tpu.memory_space<vmem>>, vector<2x32xf32>
    tpu.vector_store %arg6[%c0_27, %c0_28], %54 {strides = array<i32>} : memref<2x32xf32, #tpu.memory_space<vmem>>, vector<2x32xf32>,
    %c0_29 = arith.constant 0 : index
    %c0_30 = arith.constant 0 : index
    %56 = vector.load %arg7[%c0_29, %c0_30] : memref<2x32xf32, #tpu.memory_space<vmem>>, vector<2x32xf32>
    tpu.vector_store %arg7[%c0_29, %c0_30], %52 {strides = array<i32>} : memref<2x32xf32, #tpu.memory_space<vmem>>, vector<2x32xf32>,
    %57 = math.tanh %54 : vector<2x32xf32>
    %58 = arith.index_cast %c0_i32 : i32 to index
    %c0_31 = arith.constant 0 : index
    %c0_32 = arith.constant 0 : index
    %59 = vector.load %arg3[%58, %c0_31, %c0_32] : memref<8x2x32xf32, #tpu.memory_space<vmem>>, vector<1x2x32xf32>
    %60 = vector.shape_cast %59 : vector<1x2x32xf32> to vector<2x32xf32>
    %61 = vector.shape_cast %57 : vector<2x32xf32> to vector<1x2x32xf32>
    tpu.vector_store %arg3[%58, %c0_31, %c0_32], %61 {strides = array<i32>} : memref<8x2x32xf32, #tpu.memory_space<vmem>>, vector<1x2x32xf32>,
    %c1_i32 = arith.constant 1 : i32
    %c0_33 = arith.constant 0 : index
    %c0_34 = arith.constant 0 : index
    %62 = vector.load %arg6[%c0_33, %c0_34] : memref<2x32xf32, #tpu.memory_space<vmem>>, vector<2x32xf32>
    %c0_35 = arith.constant 0 : index
    %c0_36 = arith.constant 0 : index
    %63 = vector.load %arg7[%c0_35, %c0_36] : memref<2x32xf32, #tpu.memory_space<vmem>>, vector<2x32xf32>
    %64 = arith.truncf %62 : vector<2x32xf32> to vector<2x32xbf16>
    %c0_37 = arith.constant 0 : index
    %c0_38 = arith.constant 0 : index
    %c0_39 = arith.constant 0 : index
    %65 = vector.load %arg2[%c0_37, %c0_38, %c0_39] : memref<4x32x32xbf16, #tpu.memory_space<vmem>>, vector<1x32x32xbf16>
    %66 = vector.shape_cast %65 : vector<1x32x32xbf16> to vector<32x32xbf16>
    %cst_40 = arith.constant dense<0.000000e+00> : vector<2x32xf32>
    %67 = tpu.matmul %64, %66, %cst_40 {dimension_numbers = #tpu.dot_dimension_numbers<[1], [0], [0], [1], [0, 0, 1, 1], [], []>} : vector<2x32xbf16>, vector<32x32xbf16>, vector<2x32xf32> -> vector<2x32xf32>
    %c1_41 = arith.constant 1 : index
    %c0_42 = arith.constant 0 : index
    %c0_43 = arith.constant 0 : index
    %68 = vector.load %arg2[%c1_41, %c0_42, %c0_43] : memref<4x32x32xbf16, #tpu.memory_space<vmem>>, vector<1x32x32xbf16>
    %69 = vector.shape_cast %68 : vector<1x32x32xbf16> to vector<32x32xbf16>
    %cst_44 = arith.constant dense<0.000000e+00> : vector<2x32xf32>
    %70 = tpu.matmul %64, %69, %cst_44 {dimension_numbers = #tpu.dot_dimension_numbers<[1], [0], [0], [1], [0, 0, 1, 1], [], []>} : vector<2x32xbf16>, vector<32x32xbf16>, vector<2x32xf32> -> vector<2x32xf32>
    %c2_45 = arith.constant 2 : index
    %c0_46 = arith.constant 0 : index
    %c0_47 = arith.constant 0 : index
    %71 = vector.load %arg2[%c2_45, %c0_46, %c0_47] : memref<4x32x32xbf16, #tpu.memory_space<vmem>>, vector<1x32x32xbf16>
    %72 = vector.shape_cast %71 : vector<1x32x32xbf16> to vector<32x32xbf16>
    %cst_48 = arith.constant dense<0.000000e+00> : vector<2x32xf32>
    %73 = tpu.matmul %64, %72, %cst_48 {dimension_numbers = #tpu.dot_dimension_numbers<[1], [0], [0], [1], [0, 0, 1, 1], [], []>} : vector<2x32xbf16>, vector<32x32xbf16>, vector<2x32xf32> -> vector<2x32xf32>
    %c3_49 = arith.constant 3 : index
    %c0_50 = arith.constant 0 : index
    %c0_51 = arith.constant 0 : index
    %74 = vector.load %arg2[%c3_49, %c0_50, %c0_51] : memref<4x32x32xbf16, #tpu.memory_space<vmem>>, vector<1x32x32xbf16>
    %75 = vector.shape_cast %74 : vector<1x32x32xbf16> to vector<32x32xbf16>
    %cst_52 = arith.constant dense<0.000000e+00> : vector<2x32xf32>
    %76 = tpu.matmul %64, %75, %cst_52 {dimension_numbers = #tpu.dot_dimension_numbers<[1], [0], [0], [1], [0, 0, 1, 1], [], []>} : vector<2x32xbf16>, vector<32x32xbf16>, vector<2x32xf32> -> vector<2x32xf32>
    %77 = arith.index_cast %c1_i32 : i32 to index
    %c0_53 = arith.constant 0 : index
    %c0_54 = arith.constant 0 : index
    %c0_55 = arith.constant 0 : index
    %78 = vector.load %arg1[%77, %c0_53, %c0_54, %c0_55] : memref<8x4x2x32xf32, #tpu.memory_space<vmem>>, vector<1x4x2x32xf32>
    %79 = vector.shape_cast %78 : vector<1x4x2x32xf32> to vector<4x2x32xf32>
    %80 = vector.extract_strided_slice %79 {offsets = [0, 0, 0], sizes = [1, 2, 32], strides = [1, 1, 1]} : vector<4x2x32xf32> to vector<1x2x32xf32>
    %81 = vector.shape_cast %80 : vector<1x2x32xf32> to vector<2x32xf32>
    %82 = arith.addf %81, %67 : vector<2x32xf32>
    %83 = arith.negf %82 : vector<2x32xf32>
    %84 = math.exp %83 : vector<2x32xf32>
    %cst_56 = arith.constant 1.000000e+00 : f32
    %85 = vector.broadcast %cst_56 : f32 to vector<2x32xf32>
    %86 = arith.addf %85, %84 : vector<2x32xf32>
    %87 = arith.divf %85, %86 : vector<2x32xf32>
    %88 = vector.extract_strided_slice %79 {offsets = [1, 0, 0], sizes = [1, 2, 32], strides = [1, 1, 1]} : vector<4x2x32xf32> to vector<1x2x32xf32>
    %89 = vector.shape_cast %88 : vector<1x2x32xf32> to vector<2x32xf32>
    %90 = arith.addf %89, %70 : vector<2x32xf32>
    %91 = arith.negf %90 : vector<2x32xf32>
    %92 = math.exp %91 : vector<2x32xf32>
    %cst_57 = arith.constant 1.000000e+00 : f32
    %93 = vector.broadcast %cst_57 : f32 to vector<2x32xf32>
    %94 = arith.addf %93, %92 : vector<2x32xf32>
    %95 = arith.divf %93, %94 : vector<2x32xf32>
    %96 = vector.extract_strided_slice %79 {offsets = [2, 0, 0], sizes = [1, 2, 32], strides = [1, 1, 1]} : vector<4x2x32xf32> to vector<1x2x32xf32>
    %97 = vector.shape_cast %96 : vector<1x2x32xf32> to vector<2x32xf32>
    %98 = arith.addf %97, %73 : vector<2x32xf32>
    %99 = math.tanh %98 : vector<2x32xf32>
    %100 = vector.extract_strided_slice %79 {offsets = [3, 0, 0], sizes = [1, 2, 32], strides = [1, 1, 1]} : vector<4x2x32xf32> to vector<1x2x32xf32>
    %101 = vector.shape_cast %100 : vector<1x2x32xf32> to vector<2x32xf32>
    %102 = arith.addf %101, %76 : vector<2x32xf32>
    %103 = arith.negf %102 : vector<2x32xf32>
    %104 = math.exp %103 : vector<2x32xf32>
    %cst_58 = arith.constant 1.000000e+00 : f32
    %105 = vector.broadcast %cst_58 : f32 to vector<2x32xf32>
    %106 = arith.addf %105, %104 : vector<2x32xf32>
    %107 = arith.divf %105, %106 : vector<2x32xf32>
    %108 = arith.mulf %95, %63 : vector<2x32xf32>
    %109 = arith.mulf %87, %99 : vector<2x32xf32>
    %110 = arith.addf %108, %109 : vector<2x32xf32>
    %111 = math.tanh %110 : vector<2x32xf32>
    %112 = arith.mulf %107, %111 : vector<2x32xf32>
    %c0_59 = arith.constant 0 : index
    %c0_60 = arith.constant 0 : index
    %113 = vector.load %arg6[%c0_59, %c0_60] : memref<2x32xf32, #tpu.memory_space<vmem>>, vector<2x32xf32>
    tpu.vector_store %arg6[%c0_59, %c0_60], %112 {strides = array<i32>} : memref<2x32xf32, #tpu.memory_space<vmem>>, vector<2x32xf32>,
    %c0_61 = arith.constant 0 : index
    %c0_62 = arith.constant 0 : index
    %114 = vector.load %arg7[%c0_61, %c0_62] : memref<2x32xf32, #tpu.memory_space<vmem>>, vector<2x32xf32>
    tpu.vector_store %arg7[%c0_61, %c0_62], %110 {strides = array<i32>} : memref<2x32xf32, #tpu.memory_space<vmem>>, vector<2x32xf32>,
    %115 = math.tanh %112 : vector<2x32xf32>
    %116 = arith.index_cast %c1_i32 : i32 to index
    %c0_63 = arith.constant 0 : index
    %c0_64 = arith.constant 0 : index
    %117 = vector.load %arg3[%116, %c0_63, %c0_64] : memref<8x2x32xf32, #tpu.memory_space<vmem>>, vector<1x2x32xf32>
    %118 = vector.shape_cast %117 : vector<1x2x32xf32> to vector<2x32xf32>
    %119 = vector.shape_cast %115 : vector<2x32xf32> to vector<1x2x32xf32>
    tpu.vector_store %arg3[%116, %c0_63, %c0_64], %119 {strides = array<i32>} : memref<8x2x32xf32, #tpu.memory_space<vmem>>, vector<1x2x32xf32>,
    %c2_i32 = arith.constant 2 : i32
    %c0_65 = arith.constant 0 : index
    %c0_66 = arith.constant 0 : index
    %120 = vector.load %arg6[%c0_65, %c0_66] : memref<2x32xf32, #tpu.memory_space<vmem>>, vector<2x32xf32>
    %c0_67 = arith.constant 0 : index
    %c0_68 = arith.constant 0 : index
    %121 = vector.load %arg7[%c0_67, %c0_68] : memref<2x32xf32, #tpu.memory_space<vmem>>, vector<2x32xf32>
    %122 = arith.truncf %120 : vector<2x32xf32> to vector<2x32xbf16>
    %c0_69 = arith.constant 0 : index
    %c0_70 = arith.constant 0 : index
    %c0_71 = arith.constant 0 : index
    %123 = vector.load %arg2[%c0_69, %c0_70, %c0_71] : memref<4x32x32xbf16, #tpu.memory_space<vmem>>, vector<1x32x32xbf16>
    %124 = vector.shape_cast %123 : vector<1x32x32xbf16> to vector<32x32xbf16>
    %cst_72 = arith.constant dense<0.000000e+00> : vector<2x32xf32>
    %125 = tpu.matmul %122, %124, %cst_72 {dimension_numbers = #tpu.dot_dimension_numbers<[1], [0], [0], [1], [0, 0, 1, 1], [], []>} : vector<2x32xbf16>, vector<32x32xbf16>, vector<2x32xf32> -> vector<2x32xf32>
    %c1_73 = arith.constant 1 : index
    %c0_74 = arith.constant 0 : index
    %c0_75 = arith.constant 0 : index
    %126 = vector.load %arg2[%c1_73, %c0_74, %c0_75] : memref<4x32x32xbf16, #tpu.memory_space<vmem>>, vector<1x32x32xbf16>
    %127 = vector.shape_cast %126 : vector<1x32x32xbf16> to vector<32x32xbf16>
    %cst_76 = arith.constant dense<0.000000e+00> : vector<2x32xf32>
    %128 = tpu.matmul %122, %127, %cst_76 {dimension_numbers = #tpu.dot_dimension_numbers<[1], [0], [0], [1], [0, 0, 1, 1], [], []>} : vector<2x32xbf16>, vector<32x32xbf16>, vector<2x32xf32> -> vector<2x32xf32>
    %c2_77 = arith.constant 2 : index
    %c0_78 = arith.constant 0 : index
    %c0_79 = arith.constant 0 : index
    %129 = vector.load %arg2[%c2_77, %c0_78, %c0_79] : memref<4x32x32xbf16, #tpu.memory_space<vmem>>, vector<1x32x32xbf16>
    %130 = vector.shape_cast %129 : vector<1x32x32xbf16> to vector<32x32xbf16>
    %cst_80 = arith.constant dense<0.000000e+00> : vector<2x32xf32>
    %131 = tpu.matmul %122, %130, %cst_80 {dimension_numbers = #tpu.dot_dimension_numbers<[1], [0], [0], [1], [0, 0, 1, 1], [], []>} : vector<2x32xbf16>, vector<32x32xbf16>, vector<2x32xf32> -> vector<2x32xf32>
    %c3_81 = arith.constant 3 : index
    %c0_82 = arith.constant 0 : index
    %c0_83 = arith.constant 0 : index
    %132 = vector.load %arg2[%c3_81, %c0_82, %c0_83] : memref<4x32x32xbf16, #tpu.memory_space<vmem>>, vector<1x32x32xbf16>
    %133 = vector.shape_cast %132 : vector<1x32x32xbf16> to vector<32x32xbf16>
    %cst_84 = arith.constant dense<0.000000e+00> : vector<2x32xf32>
    %134 = tpu.matmul %122, %133, %cst_84 {dimension_numbers = #tpu.dot_dimension_numbers<[1], [0], [0], [1], [0, 0, 1, 1], [], []>} : vector<2x32xbf16>, vector<32x32xbf16>, vector<2x32xf32> -> vector<2x32xf32>
    %135 = arith.index_cast %c2_i32 : i32 to index
    %c0_85 = arith.constant 0 : index
    %c0_86 = arith.constant 0 : index
    %c0_87 = arith.constant 0 : index
    %136 = vector.load %arg1[%135, %c0_85, %c0_86, %c0_87] : memref<8x4x2x32xf32, #tpu.memory_space<vmem>>, vector<1x4x2x32xf32>
    %137 = vector.shape_cast %136 : vector<1x4x2x32xf32> to vector<4x2x32xf32>
    %138 = vector.extract_strided_slice %137 {offsets = [0, 0, 0], sizes = [1, 2, 32], strides = [1, 1, 1]} : vector<4x2x32xf32> to vector<1x2x32xf32>
    %139 = vector.shape_cast %138 : vector<1x2x32xf32> to vector<2x32xf32>
    %140 = arith.addf %139, %125 : vector<2x32xf32>
    %141 = arith.negf %140 : vector<2x32xf32>
    %142 = math.exp %141 : vector<2x32xf32>
    %cst_88 = arith.constant 1.000000e+00 : f32
    %143 = vector.broadcast %cst_88 : f32 to vector<2x32xf32>
    %144 = arith.addf %143, %142 : vector<2x32xf32>
    %145 = arith.divf %143, %144 : vector<2x32xf32>
    %146 = vector.extract_strided_slice %137 {offsets = [1, 0, 0], sizes = [1, 2, 32], strides = [1, 1, 1]} : vector<4x2x32xf32> to vector<1x2x32xf32>
    %147 = vector.shape_cast %146 : vector<1x2x32xf32> to vector<2x32xf32>
    %148 = arith.addf %147, %128 : vector<2x32xf32>
    %149 = arith.negf %148 : vector<2x32xf32>
    %150 = math.exp %149 : vector<2x32xf32>
    %cst_89 = arith.constant 1.000000e+00 : f32
    %151 = vector.broadcast %cst_89 : f32 to vector<2x32xf32>
    %152 = arith.addf %151, %150 : vector<2x32xf32>
    %153 = arith.divf %151, %152 : vector<2x32xf32>
    %154 = vector.extract_strided_slice %137 {offsets = [2, 0, 0], sizes = [1, 2, 32], strides = [1, 1, 1]} : vector<4x2x32xf32> to vector<1x2x32xf32>
    %155 = vector.shape_cast %154 : vector<1x2x32xf32> to vector<2x32xf32>
    %156 = arith.addf %155, %131 : vector<2x32xf32>
    %157 = math.tanh %156 : vector<2x32xf32>
    %158 = vector.extract_strided_slice %137 {offsets = [3, 0, 0], sizes = [1, 2, 32], strides = [1, 1, 1]} : vector<4x2x32xf32> to vector<1x2x32xf32>
    %159 = vector.shape_cast %158 : vector<1x2x32xf32> to vector<2x32xf32>
    %160 = arith.addf %159, %134 : vector<2x32xf32>
    %161 = arith.negf %160 : vector<2x32xf32>
    %162 = math.exp %161 : vector<2x32xf32>
    %cst_90 = arith.constant 1.000000e+00 : f32
    %163 = vector.broadcast %cst_90 : f32 to vector<2x32xf32>
    %164 = arith.addf %163, %162 : vector<2x32xf32>
    %165 = arith.divf %163, %164 : vector<2x32xf32>
    %166 = arith.mulf %153, %121 : vector<2x32xf32>
    %167 = arith.mulf %145, %157 : vector<2x32xf32>
    %168 = arith.addf %166, %167 : vector<2x32xf32>
    %169 = math.tanh %168 : vector<2x32xf32>
    %170 = arith.mulf %165, %169 : vector<2x32xf32>
    %c0_91 = arith.constant 0 : index
    %c0_92 = arith.constant 0 : index
    %171 = vector.load %arg6[%c0_91, %c0_92] : memref<2x32xf32, #tpu.memory_space<vmem>>, vector<2x32xf32>
    tpu.vector_store %arg6[%c0_91, %c0_92], %170 {strides = array<i32>} : memref<2x32xf32, #tpu.memory_space<vmem>>, vector<2x32xf32>,
    %c0_93 = arith.constant 0 : index
    %c0_94 = arith.constant 0 : index
    %172 = vector.load %arg7[%c0_93, %c0_94] : memref<2x32xf32, #tpu.memory_space<vmem>>, vector<2x32xf32>
    tpu.vector_store %arg7[%c0_93, %c0_94], %168 {strides = array<i32>} : memref<2x32xf32, #tpu.memory_space<vmem>>, vector<2x32xf32>,
    %173 = math.tanh %170 : vector<2x32xf32>
    %174 = arith.index_cast %c2_i32 : i32 to index
    %c0_95 = arith.constant 0 : index
    %c0_96 = arith.constant 0 : index
    %175 = vector.load %arg3[%174, %c0_95, %c0_96] : memref<8x2x32xf32, #tpu.memory_space<vmem>>, vector<1x2x32xf32>
    %176 = vector.shape_cast %175 : vector<1x2x32xf32> to vector<2x32xf32>
    %177 = vector.shape_cast %173 : vector<2x32xf32> to vector<1x2x32xf32>
    tpu.vector_store %arg3[%174, %c0_95, %c0_96], %177 {strides = array<i32>} : memref<8x2x32xf32, #tpu.memory_space<vmem>>, vector<1x2x32xf32>,
    %c3_i32 = arith.constant 3 : i32
    %c0_97 = arith.constant 0 : index
    %c0_98 = arith.constant 0 : index
    %178 = vector.load %arg6[%c0_97, %c0_98] : memref<2x32xf32, #tpu.memory_space<vmem>>, vector<2x32xf32>
    %c0_99 = arith.constant 0 : index
    %c0_100 = arith.constant 0 : index
    %179 = vector.load %arg7[%c0_99, %c0_100] : memref<2x32xf32, #tpu.memory_space<vmem>>, vector<2x32xf32>
    %180 = arith.truncf %178 : vector<2x32xf32> to vector<2x32xbf16>
    %c0_101 = arith.constant 0 : index
    %c0_102 = arith.constant 0 : index
    %c0_103 = arith.constant 0 : index
    %181 = vector.load %arg2[%c0_101, %c0_102, %c0_103] : memref<4x32x32xbf16, #tpu.memory_space<vmem>>, vector<1x32x32xbf16>
    %182 = vector.shape_cast %181 : vector<1x32x32xbf16> to vector<32x32xbf16>
    %cst_104 = arith.constant dense<0.000000e+00> : vector<2x32xf32>
    %183 = tpu.matmul %180, %182, %cst_104 {dimension_numbers = #tpu.dot_dimension_numbers<[1], [0], [0], [1], [0, 0, 1, 1], [], []>} : vector<2x32xbf16>, vector<32x32xbf16>, vector<2x32xf32> -> vector<2x32xf32>
    %c1_105 = arith.constant 1 : index
    %c0_106 = arith.constant 0 : index
    %c0_107 = arith.constant 0 : index
    %184 = vector.load %arg2[%c1_105, %c0_106, %c0_107] : memref<4x32x32xbf16, #tpu.memory_space<vmem>>, vector<1x32x32xbf16>
    %185 = vector.shape_cast %184 : vector<1x32x32xbf16> to vector<32x32xbf16>
    %cst_108 = arith.constant dense<0.000000e+00> : vector<2x32xf32>
    %186 = tpu.matmul %180, %185, %cst_108 {dimension_numbers = #tpu.dot_dimension_numbers<[1], [0], [0], [1], [0, 0, 1, 1], [], []>} : vector<2x32xbf16>, vector<32x32xbf16>, vector<2x32xf32> -> vector<2x32xf32>
    %c2_109 = arith.constant 2 : index
    %c0_110 = arith.constant 0 : index
    %c0_111 = arith.constant 0 : index
    %187 = vector.load %arg2[%c2_109, %c0_110, %c0_111] : memref<4x32x32xbf16, #tpu.memory_space<vmem>>, vector<1x32x32xbf16>
    %188 = vector.shape_cast %187 : vector<1x32x32xbf16> to vector<32x32xbf16>
    %cst_112 = arith.constant dense<0.000000e+00> : vector<2x32xf32>
    %189 = tpu.matmul %180, %188, %cst_112 {dimension_numbers = #tpu.dot_dimension_numbers<[1], [0], [0], [1], [0, 0, 1, 1], [], []>} : vector<2x32xbf16>, vector<32x32xbf16>, vector<2x32xf32> -> vector<2x32xf32>
    %c3_113 = arith.constant 3 : index
    %c0_114 = arith.constant 0 : index
    %c0_115 = arith.constant 0 : index
    %190 = vector.load %arg2[%c3_113, %c0_114, %c0_115] : memref<4x32x32xbf16, #tpu.memory_space<vmem>>, vector<1x32x32xbf16>
    %191 = vector.shape_cast %190 : vector<1x32x32xbf16> to vector<32x32xbf16>
    %cst_116 = arith.constant dense<0.000000e+00> : vector<2x32xf32>
    %192 = tpu.matmul %180, %191, %cst_116 {dimension_numbers = #tpu.dot_dimension_numbers<[1], [0], [0], [1], [0, 0, 1, 1], [], []>} : vector<2x32xbf16>, vector<32x32xbf16>, vector<2x32xf32> -> vector<2x32xf32>
    %193 = arith.index_cast %c3_i32 : i32 to index
    %c0_117 = arith.constant 0 : index
    %c0_118 = arith.constant 0 : index
    %c0_119 = arith.constant 0 : index
    %194 = vector.load %arg1[%193, %c0_117, %c0_118, %c0_119] : memref<8x4x2x32xf32, #tpu.memory_space<vmem>>, vector<1x4x2x32xf32>
    %195 = vector.shape_cast %194 : vector<1x4x2x32xf32> to vector<4x2x32xf32>
    %196 = vector.extract_strided_slice %195 {offsets = [0, 0, 0], sizes = [1, 2, 32], strides = [1, 1, 1]} : vector<4x2x32xf32> to vector<1x2x32xf32>
    %197 = vector.shape_cast %196 : vector<1x2x32xf32> to vector<2x32xf32>
    %198 = arith.addf %197, %183 : vector<2x32xf32>
    %199 = arith.negf %198 : vector<2x32xf32>
    %200 = math.exp %199 : vector<2x32xf32>
    %cst_120 = arith.constant 1.000000e+00 : f32
    %201 = vector.broadcast %cst_120 : f32 to vector<2x32xf32>
    %202 = arith.addf %201, %200 : vector<2x32xf32>
    %203 = arith.divf %201, %202 : vector<2x32xf32>
    %204 = vector.extract_strided_slice %195 {offsets = [1, 0, 0], sizes = [1, 2, 32], strides = [1, 1, 1]} : vector<4x2x32xf32> to vector<1x2x32xf32>
    %205 = vector.shape_cast %204 : vector<1x2x32xf32> to vector<2x32xf32>
    %206 = arith.addf %205, %186 : vector<2x32xf32>
    %207 = arith.negf %206 : vector<2x32xf32>
    %208 = math.exp %207 : vector<2x32xf32>
    %cst_121 = arith.constant 1.000000e+00 : f32
    %209 = vector.broadcast %cst_121 : f32 to vector<2x32xf32>
    %210 = arith.addf %209, %208 : vector<2x32xf32>
    %211 = arith.divf %209, %210 : vector<2x32xf32>
    %212 = vector.extract_strided_slice %195 {offsets = [2, 0, 0], sizes = [1, 2, 32], strides = [1, 1, 1]} : vector<4x2x32xf32> to vector<1x2x32xf32>
    %213 = vector.shape_cast %212 : vector<1x2x32xf32> to vector<2x32xf32>
    %214 = arith.addf %213, %189 : vector<2x32xf32>
    %215 = math.tanh %214 : vector<2x32xf32>
    %216 = vector.extract_strided_slice %195 {offsets = [3, 0, 0], sizes = [1, 2, 32], strides = [1, 1, 1]} : vector<4x2x32xf32> to vector<1x2x32xf32>
    %217 = vector.shape_cast %216 : vector<1x2x32xf32> to vector<2x32xf32>
    %218 = arith.addf %217, %192 : vector<2x32xf32>
    %219 = arith.negf %218 : vector<2x32xf32>
    %220 = math.exp %219 : vector<2x32xf32>
    %cst_122 = arith.constant 1.000000e+00 : f32
    %221 = vector.broadcast %cst_122 : f32 to vector<2x32xf32>
    %222 = arith.addf %221, %220 : vector<2x32xf32>
    %223 = arith.divf %221, %222 : vector<2x32xf32>
    %224 = arith.mulf %211, %179 : vector<2x32xf32>
    %225 = arith.mulf %203, %215 : vector<2x32xf32>
    %226 = arith.addf %224, %225 : vector<2x32xf32>
    %227 = math.tanh %226 : vector<2x32xf32>
    %228 = arith.mulf %223, %227 : vector<2x32xf32>
    %c0_123 = arith.constant 0 : index
    %c0_124 = arith.constant 0 : index
    %229 = vector.load %arg6[%c0_123, %c0_124] : memref<2x32xf32, #tpu.memory_space<vmem>>, vector<2x32xf32>
    tpu.vector_store %arg6[%c0_123, %c0_124], %228 {strides = array<i32>} : memref<2x32xf32, #tpu.memory_space<vmem>>, vector<2x32xf32>,
    %c0_125 = arith.constant 0 : index
    %c0_126 = arith.constant 0 : index
    %230 = vector.load %arg7[%c0_125, %c0_126] : memref<2x32xf32, #tpu.memory_space<vmem>>, vector<2x32xf32>
    tpu.vector_store %arg7[%c0_125, %c0_126], %226 {strides = array<i32>} : memref<2x32xf32, #tpu.memory_space<vmem>>, vector<2x32xf32>,
    %231 = math.tanh %228 : vector<2x32xf32>
    %232 = arith.index_cast %c3_i32 : i32 to index
    %c0_127 = arith.constant 0 : index
    %c0_128 = arith.constant 0 : index
    %233 = vector.load %arg3[%232, %c0_127, %c0_128] : memref<8x2x32xf32, #tpu.memory_space<vmem>>, vector<1x2x32xf32>
    %234 = vector.shape_cast %233 : vector<1x2x32xf32> to vector<2x32xf32>
    %235 = vector.shape_cast %231 : vector<2x32xf32> to vector<1x2x32xf32>
    tpu.vector_store %arg3[%232, %c0_127, %c0_128], %235 {strides = array<i32>} : memref<8x2x32xf32, #tpu.memory_space<vmem>>, vector<1x2x32xf32>,
    %c4_i32 = arith.constant 4 : i32
    %c0_129 = arith.constant 0 : index
    %c0_130 = arith.constant 0 : index
    %236 = vector.load %arg6[%c0_129, %c0_130] : memref<2x32xf32, #tpu.memory_space<vmem>>, vector<2x32xf32>
    %c0_131 = arith.constant 0 : index
    %c0_132 = arith.constant 0 : index
    %237 = vector.load %arg7[%c0_131, %c0_132] : memref<2x32xf32, #tpu.memory_space<vmem>>, vector<2x32xf32>
    %238 = arith.truncf %236 : vector<2x32xf32> to vector<2x32xbf16>
    %c0_133 = arith.constant 0 : index
    %c0_134 = arith.constant 0 : index
    %c0_135 = arith.constant 0 : index
    %239 = vector.load %arg2[%c0_133, %c0_134, %c0_135] : memref<4x32x32xbf16, #tpu.memory_space<vmem>>, vector<1x32x32xbf16>
    %240 = vector.shape_cast %239 : vector<1x32x32xbf16> to vector<32x32xbf16>
    %cst_136 = arith.constant dense<0.000000e+00> : vector<2x32xf32>
    %241 = tpu.matmul %238, %240, %cst_136 {dimension_numbers = #tpu.dot_dimension_numbers<[1], [0], [0], [1], [0, 0, 1, 1], [], []>} : vector<2x32xbf16>, vector<32x32xbf16>, vector<2x32xf32> -> vector<2x32xf32>
    %c1_137 = arith.constant 1 : index
    %c0_138 = arith.constant 0 : index
    %c0_139 = arith.constant 0 : index
    %242 = vector.load %arg2[%c1_137, %c0_138, %c0_139] : memref<4x32x32xbf16, #tpu.memory_space<vmem>>, vector<1x32x32xbf16>
    %243 = vector.shape_cast %242 : vector<1x32x32xbf16> to vector<32x32xbf16>
    %cst_140 = arith.constant dense<0.000000e+00> : vector<2x32xf32>
    %244 = tpu.matmul %238, %243, %cst_140 {dimension_numbers = #tpu.dot_dimension_numbers<[1], [0], [0], [1], [0, 0, 1, 1], [], []>} : vector<2x32xbf16>, vector<32x32xbf16>, vector<2x32xf32> -> vector<2x32xf32>
    %c2_141 = arith.constant 2 : index
    %c0_142 = arith.constant 0 : index
    %c0_143 = arith.constant 0 : index
    %245 = vector.load %arg2[%c2_141, %c0_142, %c0_143] : memref<4x32x32xbf16, #tpu.memory_space<vmem>>, vector<1x32x32xbf16>
    %246 = vector.shape_cast %245 : vector<1x32x32xbf16> to vector<32x32xbf16>
    %cst_144 = arith.constant dense<0.000000e+00> : vector<2x32xf32>
    %247 = tpu.matmul %238, %246, %cst_144 {dimension_numbers = #tpu.dot_dimension_numbers<[1], [0], [0], [1], [0, 0, 1, 1], [], []>} : vector<2x32xbf16>, vector<32x32xbf16>, vector<2x32xf32> -> vector<2x32xf32>
    %c3_145 = arith.constant 3 : index
    %c0_146 = arith.constant 0 : index
    %c0_147 = arith.constant 0 : index
    %248 = vector.load %arg2[%c3_145, %c0_146, %c0_147] : memref<4x32x32xbf16, #tpu.memory_space<vmem>>, vector<1x32x32xbf16>
    %249 = vector.shape_cast %248 : vector<1x32x32xbf16> to vector<32x32xbf16>
    %cst_148 = arith.constant dense<0.000000e+00> : vector<2x32xf32>
    %250 = tpu.matmul %238, %249, %cst_148 {dimension_numbers = #tpu.dot_dimension_numbers<[1], [0], [0], [1], [0, 0, 1, 1], [], []>} : vector<2x32xbf16>, vector<32x32xbf16>, vector<2x32xf32> -> vector<2x32xf32>
    %251 = arith.index_cast %c4_i32 : i32 to index
    %c0_149 = arith.constant 0 : index
    %c0_150 = arith.constant 0 : index
    %c0_151 = arith.constant 0 : index
    %252 = vector.load %arg1[%251, %c0_149, %c0_150, %c0_151] : memref<8x4x2x32xf32, #tpu.memory_space<vmem>>, vector<1x4x2x32xf32>
    %253 = vector.shape_cast %252 : vector<1x4x2x32xf32> to vector<4x2x32xf32>
    %254 = vector.extract_strided_slice %253 {offsets = [0, 0, 0], sizes = [1, 2, 32], strides = [1, 1, 1]} : vector<4x2x32xf32> to vector<1x2x32xf32>
    %255 = vector.shape_cast %254 : vector<1x2x32xf32> to vector<2x32xf32>
    %256 = arith.addf %255, %241 : vector<2x32xf32>
    %257 = arith.negf %256 : vector<2x32xf32>
    %258 = math.exp %257 : vector<2x32xf32>
    %cst_152 = arith.constant 1.000000e+00 : f32
    %259 = vector.broadcast %cst_152 : f32 to vector<2x32xf32>
    %260 = arith.addf %259, %258 : vector<2x32xf32>
    %261 = arith.divf %259, %260 : vector<2x32xf32>
    %262 = vector.extract_strided_slice %253 {offsets = [1, 0, 0], sizes = [1, 2, 32], strides = [1, 1, 1]} : vector<4x2x32xf32> to vector<1x2x32xf32>
    %263 = vector.shape_cast %262 : vector<1x2x32xf32> to vector<2x32xf32>
    %264 = arith.addf %263, %244 : vector<2x32xf32>
    %265 = arith.negf %264 : vector<2x32xf32>
    %266 = math.exp %265 : vector<2x32xf32>
    %cst_153 = arith.constant 1.000000e+00 : f32
    %267 = vector.broadcast %cst_153 : f32 to vector<2x32xf32>
    %268 = arith.addf %267, %266 : vector<2x32xf32>
    %269 = arith.divf %267, %268 : vector<2x32xf32>
    %270 = vector.extract_strided_slice %253 {offsets = [2, 0, 0], sizes = [1, 2, 32], strides = [1, 1, 1]} : vector<4x2x32xf32> to vector<1x2x32xf32>
    %271 = vector.shape_cast %270 : vector<1x2x32xf32> to vector<2x32xf32>
    %272 = arith.addf %271, %247 : vector<2x32xf32>
    %273 = math.tanh %272 : vector<2x32xf32>
    %274 = vector.extract_strided_slice %253 {offsets = [3, 0, 0], sizes = [1, 2, 32], strides = [1, 1, 1]} : vector<4x2x32xf32> to vector<1x2x32xf32>
    %275 = vector.shape_cast %274 : vector<1x2x32xf32> to vector<2x32xf32>
    %276 = arith.addf %275, %250 : vector<2x32xf32>
    %277 = arith.negf %276 : vector<2x32xf32>
    %278 = math.exp %277 : vector<2x32xf32>
    %cst_154 = arith.constant 1.000000e+00 : f32
    %279 = vector.broadcast %cst_154 : f32 to vector<2x32xf32>
    %280 = arith.addf %279, %278 : vector<2x32xf32>
    %281 = arith.divf %279, %280 : vector<2x32xf32>
    %282 = arith.mulf %269, %237 : vector<2x32xf32>
    %283 = arith.mulf %261, %273 : vector<2x32xf32>
    %284 = arith.addf %282, %283 : vector<2x32xf32>
    %285 = math.tanh %284 : vector<2x32xf32>
    %286 = arith.mulf %281, %285 : vector<2x32xf32>
    %c0_155 = arith.constant 0 : index
    %c0_156 = arith.constant 0 : index
    %287 = vector.load %arg6[%c0_155, %c0_156] : memref<2x32xf32, #tpu.memory_space<vmem>>, vector<2x32xf32>
    tpu.vector_store %arg6[%c0_155, %c0_156], %286 {strides = array<i32>} : memref<2x32xf32, #tpu.memory_space<vmem>>, vector<2x32xf32>,
    %c0_157 = arith.constant 0 : index
    %c0_158 = arith.constant 0 : index
    %288 = vector.load %arg7[%c0_157, %c0_158] : memref<2x32xf32, #tpu.memory_space<vmem>>, vector<2x32xf32>
    tpu.vector_store %arg7[%c0_157, %c0_158], %284 {strides = array<i32>} : memref<2x32xf32, #tpu.memory_space<vmem>>, vector<2x32xf32>,
    %289 = math.tanh %286 : vector<2x32xf32>
    %290 = arith.index_cast %c4_i32 : i32 to index
    %c0_159 = arith.constant 0 : index
    %c0_160 = arith.constant 0 : index
    %291 = vector.load %arg3[%290, %c0_159, %c0_160] : memref<8x2x32xf32, #tpu.memory_space<vmem>>, vector<1x2x32xf32>
    %292 = vector.shape_cast %291 : vector<1x2x32xf32> to vector<2x32xf32>
    %293 = vector.shape_cast %289 : vector<2x32xf32> to vector<1x2x32xf32>
    tpu.vector_store %arg3[%290, %c0_159, %c0_160], %293 {strides = array<i32>} : memref<8x2x32xf32, #tpu.memory_space<vmem>>, vector<1x2x32xf32>,
    %c5_i32 = arith.constant 5 : i32
    %c0_161 = arith.constant 0 : index
    %c0_162 = arith.constant 0 : index
    %294 = vector.load %arg6[%c0_161, %c0_162] : memref<2x32xf32, #tpu.memory_space<vmem>>, vector<2x32xf32>
    %c0_163 = arith.constant 0 : index
    %c0_164 = arith.constant 0 : index
    %295 = vector.load %arg7[%c0_163, %c0_164] : memref<2x32xf32, #tpu.memory_space<vmem>>, vector<2x32xf32>
    %296 = arith.truncf %294 : vector<2x32xf32> to vector<2x32xbf16>
    %c0_165 = arith.constant 0 : index
    %c0_166 = arith.constant 0 : index
    %c0_167 = arith.constant 0 : index
    %297 = vector.load %arg2[%c0_165, %c0_166, %c0_167] : memref<4x32x32xbf16, #tpu.memory_space<vmem>>, vector<1x32x32xbf16>
    %298 = vector.shape_cast %297 : vector<1x32x32xbf16> to vector<32x32xbf16>
    %cst_168 = arith.constant dense<0.000000e+00> : vector<2x32xf32>
    %299 = tpu.matmul %296, %298, %cst_168 {dimension_numbers = #tpu.dot_dimension_numbers<[1], [0], [0], [1], [0, 0, 1, 1], [], []>} : vector<2x32xbf16>, vector<32x32xbf16>, vector<2x32xf32> -> vector<2x32xf32>
    %c1_169 = arith.constant 1 : index
    %c0_170 = arith.constant 0 : index
    %c0_171 = arith.constant 0 : index
    %300 = vector.load %arg2[%c1_169, %c0_170, %c0_171] : memref<4x32x32xbf16, #tpu.memory_space<vmem>>, vector<1x32x32xbf16>
    %301 = vector.shape_cast %300 : vector<1x32x32xbf16> to vector<32x32xbf16>
    %cst_172 = arith.constant dense<0.000000e+00> : vector<2x32xf32>
    %302 = tpu.matmul %296, %301, %cst_172 {dimension_numbers = #tpu.dot_dimension_numbers<[1], [0], [0], [1], [0, 0, 1, 1], [], []>} : vector<2x32xbf16>, vector<32x32xbf16>, vector<2x32xf32> -> vector<2x32xf32>
    %c2_173 = arith.constant 2 : index
    %c0_174 = arith.constant 0 : index
    %c0_175 = arith.constant 0 : index
    %303 = vector.load %arg2[%c2_173, %c0_174, %c0_175] : memref<4x32x32xbf16, #tpu.memory_space<vmem>>, vector<1x32x32xbf16>
    %304 = vector.shape_cast %303 : vector<1x32x32xbf16> to vector<32x32xbf16>
    %cst_176 = arith.constant dense<0.000000e+00> : vector<2x32xf32>
    %305 = tpu.matmul %296, %304, %cst_176 {dimension_numbers = #tpu.dot_dimension_numbers<[1], [0], [0], [1], [0, 0, 1, 1], [], []>} : vector<2x32xbf16>, vector<32x32xbf16>, vector<2x32xf32> -> vector<2x32xf32>
    %c3_177 = arith.constant 3 : index
    %c0_178 = arith.constant 0 : index
    %c0_179 = arith.constant 0 : index
    %306 = vector.load %arg2[%c3_177, %c0_178, %c0_179] : memref<4x32x32xbf16, #tpu.memory_space<vmem>>, vector<1x32x32xbf16>
    %307 = vector.shape_cast %306 : vector<1x32x32xbf16> to vector<32x32xbf16>
    %cst_180 = arith.constant dense<0.000000e+00> : vector<2x32xf32>
    %308 = tpu.matmul %296, %307, %cst_180 {dimension_numbers = #tpu.dot_dimension_numbers<[1], [0], [0], [1], [0, 0, 1, 1], [], []>} : vector<2x32xbf16>, vector<32x32xbf16>, vector<2x32xf32> -> vector<2x32xf32>
    %309 = arith.index_cast %c5_i32 : i32 to index
    %c0_181 = arith.constant 0 : index
    %c0_182 = arith.constant 0 : index
    %c0_183 = arith.constant 0 : index
    %310 = vector.load %arg1[%309, %c0_181, %c0_182, %c0_183] : memref<8x4x2x32xf32, #tpu.memory_space<vmem>>, vector<1x4x2x32xf32>
    %311 = vector.shape_cast %310 : vector<1x4x2x32xf32> to vector<4x2x32xf32>
    %312 = vector.extract_strided_slice %311 {offsets = [0, 0, 0], sizes = [1, 2, 32], strides = [1, 1, 1]} : vector<4x2x32xf32> to vector<1x2x32xf32>
    %313 = vector.shape_cast %312 : vector<1x2x32xf32> to vector<2x32xf32>
    %314 = arith.addf %313, %299 : vector<2x32xf32>
    %315 = arith.negf %314 : vector<2x32xf32>
    %316 = math.exp %315 : vector<2x32xf32>
    %cst_184 = arith.constant 1.000000e+00 : f32
    %317 = vector.broadcast %cst_184 : f32 to vector<2x32xf32>
    %318 = arith.addf %317, %316 : vector<2x32xf32>
    %319 = arith.divf %317, %318 : vector<2x32xf32>
    %320 = vector.extract_strided_slice %311 {offsets = [1, 0, 0], sizes = [1, 2, 32], strides = [1, 1, 1]} : vector<4x2x32xf32> to vector<1x2x32xf32>
    %321 = vector.shape_cast %320 : vector<1x2x32xf32> to vector<2x32xf32>
    %322 = arith.addf %321, %302 : vector<2x32xf32>
    %323 = arith.negf %322 : vector<2x32xf32>
    %324 = math.exp %323 : vector<2x32xf32>
    %cst_185 = arith.constant 1.000000e+00 : f32
    %325 = vector.broadcast %cst_185 : f32 to vector<2x32xf32>
    %326 = arith.addf %325, %324 : vector<2x32xf32>
    %327 = arith.divf %325, %326 : vector<2x32xf32>
    %328 = vector.extract_strided_slice %311 {offsets = [2, 0, 0], sizes = [1, 2, 32], strides = [1, 1, 1]} : vector<4x2x32xf32> to vector<1x2x32xf32>
    %329 = vector.shape_cast %328 : vector<1x2x32xf32> to vector<2x32xf32>
    %330 = arith.addf %329, %305 : vector<2x32xf32>
    %331 = math.tanh %330 : vector<2x32xf32>
    %332 = vector.extract_strided_slice %311 {offsets = [3, 0, 0], sizes = [1, 2, 32], strides = [1, 1, 1]} : vector<4x2x32xf32> to vector<1x2x32xf32>
    %333 = vector.shape_cast %332 : vector<1x2x32xf32> to vector<2x32xf32>
    %334 = arith.addf %333, %308 : vector<2x32xf32>
    %335 = arith.negf %334 : vector<2x32xf32>
    %336 = math.exp %335 : vector<2x32xf32>
    %cst_186 = arith.constant 1.000000e+00 : f32
    %337 = vector.broadcast %cst_186 : f32 to vector<2x32xf32>
    %338 = arith.addf %337, %336 : vector<2x32xf32>
    %339 = arith.divf %337, %338 : vector<2x32xf32>
    %340 = arith.mulf %327, %295 : vector<2x32xf32>
    %341 = arith.mulf %319, %331 : vector<2x32xf32>
    %342 = arith.addf %340, %341 : vector<2x32xf32>
    %343 = math.tanh %342 : vector<2x32xf32>
    %344 = arith.mulf %339, %343 : vector<2x32xf32>
    %c0_187 = arith.constant 0 : index
    %c0_188 = arith.constant 0 : index
    %345 = vector.load %arg6[%c0_187, %c0_188] : memref<2x32xf32, #tpu.memory_space<vmem>>, vector<2x32xf32>
    tpu.vector_store %arg6[%c0_187, %c0_188], %344 {strides = array<i32>} : memref<2x32xf32, #tpu.memory_space<vmem>>, vector<2x32xf32>,
    %c0_189 = arith.constant 0 : index
    %c0_190 = arith.constant 0 : index
    %346 = vector.load %arg7[%c0_189, %c0_190] : memref<2x32xf32, #tpu.memory_space<vmem>>, vector<2x32xf32>
    tpu.vector_store %arg7[%c0_189, %c0_190], %342 {strides = array<i32>} : memref<2x32xf32, #tpu.memory_space<vmem>>, vector<2x32xf32>,
    %347 = math.tanh %344 : vector<2x32xf32>
    %348 = arith.index_cast %c5_i32 : i32 to index
    %c0_191 = arith.constant 0 : index
    %c0_192 = arith.constant 0 : index
    %349 = vector.load %arg3[%348, %c0_191, %c0_192] : memref<8x2x32xf32, #tpu.memory_space<vmem>>, vector<1x2x32xf32>
    %350 = vector.shape_cast %349 : vector<1x2x32xf32> to vector<2x32xf32>
    %351 = vector.shape_cast %347 : vector<2x32xf32> to vector<1x2x32xf32>
    tpu.vector_store %arg3[%348, %c0_191, %c0_192], %351 {strides = array<i32>} : memref<8x2x32xf32, #tpu.memory_space<vmem>>, vector<1x2x32xf32>,
    %c6_i32 = arith.constant 6 : i32
    %c0_193 = arith.constant 0 : index
    %c0_194 = arith.constant 0 : index
    %352 = vector.load %arg6[%c0_193, %c0_194] : memref<2x32xf32, #tpu.memory_space<vmem>>, vector<2x32xf32>
    %c0_195 = arith.constant 0 : index
    %c0_196 = arith.constant 0 : index
    %353 = vector.load %arg7[%c0_195, %c0_196] : memref<2x32xf32, #tpu.memory_space<vmem>>, vector<2x32xf32>
    %354 = arith.truncf %352 : vector<2x32xf32> to vector<2x32xbf16>
    %c0_197 = arith.constant 0 : index
    %c0_198 = arith.constant 0 : index
    %c0_199 = arith.constant 0 : index
    %355 = vector.load %arg2[%c0_197, %c0_198, %c0_199] : memref<4x32x32xbf16, #tpu.memory_space<vmem>>, vector<1x32x32xbf16>
    %356 = vector.shape_cast %355 : vector<1x32x32xbf16> to vector<32x32xbf16>
    %cst_200 = arith.constant dense<0.000000e+00> : vector<2x32xf32>
    %357 = tpu.matmul %354, %356, %cst_200 {dimension_numbers = #tpu.dot_dimension_numbers<[1], [0], [0], [1], [0, 0, 1, 1], [], []>} : vector<2x32xbf16>, vector<32x32xbf16>, vector<2x32xf32> -> vector<2x32xf32>
    %c1_201 = arith.constant 1 : index
    %c0_202 = arith.constant 0 : index
    %c0_203 = arith.constant 0 : index
    %358 = vector.load %arg2[%c1_201, %c0_202, %c0_203] : memref<4x32x32xbf16, #tpu.memory_space<vmem>>, vector<1x32x32xbf16>
    %359 = vector.shape_cast %358 : vector<1x32x32xbf16> to vector<32x32xbf16>
    %cst_204 = arith.constant dense<0.000000e+00> : vector<2x32xf32>
    %360 = tpu.matmul %354, %359, %cst_204 {dimension_numbers = #tpu.dot_dimension_numbers<[1], [0], [0], [1], [0, 0, 1, 1], [], []>} : vector<2x32xbf16>, vector<32x32xbf16>, vector<2x32xf32> -> vector<2x32xf32>
    %c2_205 = arith.constant 2 : index
    %c0_206 = arith.constant 0 : index
    %c0_207 = arith.constant 0 : index
    %361 = vector.load %arg2[%c2_205, %c0_206, %c0_207] : memref<4x32x32xbf16, #tpu.memory_space<vmem>>, vector<1x32x32xbf16>
    %362 = vector.shape_cast %361 : vector<1x32x32xbf16> to vector<32x32xbf16>
    %cst_208 = arith.constant dense<0.000000e+00> : vector<2x32xf32>
    %363 = tpu.matmul %354, %362, %cst_208 {dimension_numbers = #tpu.dot_dimension_numbers<[1], [0], [0], [1], [0, 0, 1, 1], [], []>} : vector<2x32xbf16>, vector<32x32xbf16>, vector<2x32xf32> -> vector<2x32xf32>
    %c3_209 = arith.constant 3 : index
    %c0_210 = arith.constant 0 : index
    %c0_211 = arith.constant 0 : index
    %364 = vector.load %arg2[%c3_209, %c0_210, %c0_211] : memref<4x32x32xbf16, #tpu.memory_space<vmem>>, vector<1x32x32xbf16>
    %365 = vector.shape_cast %364 : vector<1x32x32xbf16> to vector<32x32xbf16>
    %cst_212 = arith.constant dense<0.000000e+00> : vector<2x32xf32>
    %366 = tpu.matmul %354, %365, %cst_212 {dimension_numbers = #tpu.dot_dimension_numbers<[1], [0], [0], [1], [0, 0, 1, 1], [], []>} : vector<2x32xbf16>, vector<32x32xbf16>, vector<2x32xf32> -> vector<2x32xf32>
    %367 = arith.index_cast %c6_i32 : i32 to index
    %c0_213 = arith.constant 0 : index
    %c0_214 = arith.constant 0 : index
    %c0_215 = arith.constant 0 : index
    %368 = vector.load %arg1[%367, %c0_213, %c0_214, %c0_215] : memref<8x4x2x32xf32, #tpu.memory_space<vmem>>, vector<1x4x2x32xf32>
    %369 = vector.shape_cast %368 : vector<1x4x2x32xf32> to vector<4x2x32xf32>
    %370 = vector.extract_strided_slice %369 {offsets = [0, 0, 0], sizes = [1, 2, 32], strides = [1, 1, 1]} : vector<4x2x32xf32> to vector<1x2x32xf32>
    %371 = vector.shape_cast %370 : vector<1x2x32xf32> to vector<2x32xf32>
    %372 = arith.addf %371, %357 : vector<2x32xf32>
    %373 = arith.negf %372 : vector<2x32xf32>
    %374 = math.exp %373 : vector<2x32xf32>
    %cst_216 = arith.constant 1.000000e+00 : f32
    %375 = vector.broadcast %cst_216 : f32 to vector<2x32xf32>
    %376 = arith.addf %375, %374 : vector<2x32xf32>
    %377 = arith.divf %375, %376 : vector<2x32xf32>
    %378 = vector.extract_strided_slice %369 {offsets = [1, 0, 0], sizes = [1, 2, 32], strides = [1, 1, 1]} : vector<4x2x32xf32> to vector<1x2x32xf32>
    %379 = vector.shape_cast %378 : vector<1x2x32xf32> to vector<2x32xf32>
    %380 = arith.addf %379, %360 : vector<2x32xf32>
    %381 = arith.negf %380 : vector<2x32xf32>
    %382 = math.exp %381 : vector<2x32xf32>
    %cst_217 = arith.constant 1.000000e+00 : f32
    %383 = vector.broadcast %cst_217 : f32 to vector<2x32xf32>
    %384 = arith.addf %383, %382 : vector<2x32xf32>
    %385 = arith.divf %383, %384 : vector<2x32xf32>
    %386 = vector.extract_strided_slice %369 {offsets = [2, 0, 0], sizes = [1, 2, 32], strides = [1, 1, 1]} : vector<4x2x32xf32> to vector<1x2x32xf32>
    %387 = vector.shape_cast %386 : vector<1x2x32xf32> to vector<2x32xf32>
    %388 = arith.addf %387, %363 : vector<2x32xf32>
    %389 = math.tanh %388 : vector<2x32xf32>
    %390 = vector.extract_strided_slice %369 {offsets = [3, 0, 0], sizes = [1, 2, 32], strides = [1, 1, 1]} : vector<4x2x32xf32> to vector<1x2x32xf32>
    %391 = vector.shape_cast %390 : vector<1x2x32xf32> to vector<2x32xf32>
    %392 = arith.addf %391, %366 : vector<2x32xf32>
    %393 = arith.negf %392 : vector<2x32xf32>
    %394 = math.exp %393 : vector<2x32xf32>
    %cst_218 = arith.constant 1.000000e+00 : f32
    %395 = vector.broadcast %cst_218 : f32 to vector<2x32xf32>
    %396 = arith.addf %395, %394 : vector<2x32xf32>
    %397 = arith.divf %395, %396 : vector<2x32xf32>
    %398 = arith.mulf %385, %353 : vector<2x32xf32>
    %399 = arith.mulf %377, %389 : vector<2x32xf32>
    %400 = arith.addf %398, %399 : vector<2x32xf32>
    %401 = math.tanh %400 : vector<2x32xf32>
    %402 = arith.mulf %397, %401 : vector<2x32xf32>
    %c0_219 = arith.constant 0 : index
    %c0_220 = arith.constant 0 : index
    %403 = vector.load %arg6[%c0_219, %c0_220] : memref<2x32xf32, #tpu.memory_space<vmem>>, vector<2x32xf32>
    tpu.vector_store %arg6[%c0_219, %c0_220], %402 {strides = array<i32>} : memref<2x32xf32, #tpu.memory_space<vmem>>, vector<2x32xf32>,
    %c0_221 = arith.constant 0 : index
    %c0_222 = arith.constant 0 : index
    %404 = vector.load %arg7[%c0_221, %c0_222] : memref<2x32xf32, #tpu.memory_space<vmem>>, vector<2x32xf32>
    tpu.vector_store %arg7[%c0_221, %c0_222], %400 {strides = array<i32>} : memref<2x32xf32, #tpu.memory_space<vmem>>, vector<2x32xf32>,
    %405 = math.tanh %402 : vector<2x32xf32>
    %406 = arith.index_cast %c6_i32 : i32 to index
    %c0_223 = arith.constant 0 : index
    %c0_224 = arith.constant 0 : index
    %407 = vector.load %arg3[%406, %c0_223, %c0_224] : memref<8x2x32xf32, #tpu.memory_space<vmem>>, vector<1x2x32xf32>
    %408 = vector.shape_cast %407 : vector<1x2x32xf32> to vector<2x32xf32>
    %409 = vector.shape_cast %405 : vector<2x32xf32> to vector<1x2x32xf32>
    tpu.vector_store %arg3[%406, %c0_223, %c0_224], %409 {strides = array<i32>} : memref<8x2x32xf32, #tpu.memory_space<vmem>>, vector<1x2x32xf32>,
    %c7_i32 = arith.constant 7 : i32
    %c0_225 = arith.constant 0 : index
    %c0_226 = arith.constant 0 : index
    %410 = vector.load %arg6[%c0_225, %c0_226] : memref<2x32xf32, #tpu.memory_space<vmem>>, vector<2x32xf32>
    %c0_227 = arith.constant 0 : index
    %c0_228 = arith.constant 0 : index
    %411 = vector.load %arg7[%c0_227, %c0_228] : memref<2x32xf32, #tpu.memory_space<vmem>>, vector<2x32xf32>
    %412 = arith.truncf %410 : vector<2x32xf32> to vector<2x32xbf16>
    %c0_229 = arith.constant 0 : index
    %c0_230 = arith.constant 0 : index
    %c0_231 = arith.constant 0 : index
    %413 = vector.load %arg2[%c0_229, %c0_230, %c0_231] : memref<4x32x32xbf16, #tpu.memory_space<vmem>>, vector<1x32x32xbf16>
    %414 = vector.shape_cast %413 : vector<1x32x32xbf16> to vector<32x32xbf16>
    %cst_232 = arith.constant dense<0.000000e+00> : vector<2x32xf32>
    %415 = tpu.matmul %412, %414, %cst_232 {dimension_numbers = #tpu.dot_dimension_numbers<[1], [0], [0], [1], [0, 0, 1, 1], [], []>} : vector<2x32xbf16>, vector<32x32xbf16>, vector<2x32xf32> -> vector<2x32xf32>
    %c1_233 = arith.constant 1 : index
    %c0_234 = arith.constant 0 : index
    %c0_235 = arith.constant 0 : index
    %416 = vector.load %arg2[%c1_233, %c0_234, %c0_235] : memref<4x32x32xbf16, #tpu.memory_space<vmem>>, vector<1x32x32xbf16>
    %417 = vector.shape_cast %416 : vector<1x32x32xbf16> to vector<32x32xbf16>
    %cst_236 = arith.constant dense<0.000000e+00> : vector<2x32xf32>
    %418 = tpu.matmul %412, %417, %cst_236 {dimension_numbers = #tpu.dot_dimension_numbers<[1], [0], [0], [1], [0, 0, 1, 1], [], []>} : vector<2x32xbf16>, vector<32x32xbf16>, vector<2x32xf32> -> vector<2x32xf32>
    %c2_237 = arith.constant 2 : index
    %c0_238 = arith.constant 0 : index
    %c0_239 = arith.constant 0 : index
    %419 = vector.load %arg2[%c2_237, %c0_238, %c0_239] : memref<4x32x32xbf16, #tpu.memory_space<vmem>>, vector<1x32x32xbf16>
    %420 = vector.shape_cast %419 : vector<1x32x32xbf16> to vector<32x32xbf16>
    %cst_240 = arith.constant dense<0.000000e+00> : vector<2x32xf32>
    %421 = tpu.matmul %412, %420, %cst_240 {dimension_numbers = #tpu.dot_dimension_numbers<[1], [0], [0], [1], [0, 0, 1, 1], [], []>} : vector<2x32xbf16>, vector<32x32xbf16>, vector<2x32xf32> -> vector<2x32xf32>
    %c3_241 = arith.constant 3 : index
    %c0_242 = arith.constant 0 : index
    %c0_243 = arith.constant 0 : index
    %422 = vector.load %arg2[%c3_241, %c0_242, %c0_243] : memref<4x32x32xbf16, #tpu.memory_space<vmem>>, vector<1x32x32xbf16>
    %423 = vector.shape_cast %422 : vector<1x32x32xbf16> to vector<32x32xbf16>
    %cst_244 = arith.constant dense<0.000000e+00> : vector<2x32xf32>
    %424 = tpu.matmul %412, %423, %cst_244 {dimension_numbers = #tpu.dot_dimension_numbers<[1], [0], [0], [1], [0, 0, 1, 1], [], []>} : vector<2x32xbf16>, vector<32x32xbf16>, vector<2x32xf32> -> vector<2x32xf32>
    %425 = arith.index_cast %c7_i32 : i32 to index
    %c0_245 = arith.constant 0 : index
    %c0_246 = arith.constant 0 : index
    %c0_247 = arith.constant 0 : index
    %426 = vector.load %arg1[%425, %c0_245, %c0_246, %c0_247] : memref<8x4x2x32xf32, #tpu.memory_space<vmem>>, vector<1x4x2x32xf32>
    %427 = vector.shape_cast %426 : vector<1x4x2x32xf32> to vector<4x2x32xf32>
    %428 = vector.extract_strided_slice %427 {offsets = [0, 0, 0], sizes = [1, 2, 32], strides = [1, 1, 1]} : vector<4x2x32xf32> to vector<1x2x32xf32>
    %429 = vector.shape_cast %428 : vector<1x2x32xf32> to vector<2x32xf32>
    %430 = arith.addf %429, %415 : vector<2x32xf32>
    %431 = arith.negf %430 : vector<2x32xf32>
    %432 = math.exp %431 : vector<2x32xf32>
    %cst_248 = arith.constant 1.000000e+00 : f32
    %433 = vector.broadcast %cst_248 : f32 to vector<2x32xf32>
    %434 = arith.addf %433, %432 : vector<2x32xf32>
    %435 = arith.divf %433, %434 : vector<2x32xf32>
    %436 = vector.extract_strided_slice %427 {offsets = [1, 0, 0], sizes = [1, 2, 32], strides = [1, 1, 1]} : vector<4x2x32xf32> to vector<1x2x32xf32>
    %437 = vector.shape_cast %436 : vector<1x2x32xf32> to vector<2x32xf32>
    %438 = arith.addf %437, %418 : vector<2x32xf32>
    %439 = arith.negf %438 : vector<2x32xf32>
    %440 = math.exp %439 : vector<2x32xf32>
    %cst_249 = arith.constant 1.000000e+00 : f32
    %441 = vector.broadcast %cst_249 : f32 to vector<2x32xf32>
    %442 = arith.addf %441, %440 : vector<2x32xf32>
    %443 = arith.divf %441, %442 : vector<2x32xf32>
    %444 = vector.extract_strided_slice %427 {offsets = [2, 0, 0], sizes = [1, 2, 32], strides = [1, 1, 1]} : vector<4x2x32xf32> to vector<1x2x32xf32>
    %445 = vector.shape_cast %444 : vector<1x2x32xf32> to vector<2x32xf32>
    %446 = arith.addf %445, %421 : vector<2x32xf32>
    %447 = math.tanh %446 : vector<2x32xf32>
    %448 = vector.extract_strided_slice %427 {offsets = [3, 0, 0], sizes = [1, 2, 32], strides = [1, 1, 1]} : vector<4x2x32xf32> to vector<1x2x32xf32>
    %449 = vector.shape_cast %448 : vector<1x2x32xf32> to vector<2x32xf32>
    %450 = arith.addf %449, %424 : vector<2x32xf32>
    %451 = arith.negf %450 : vector<2x32xf32>
    %452 = math.exp %451 : vector<2x32xf32>
    %cst_250 = arith.constant 1.000000e+00 : f32
    %453 = vector.broadcast %cst_250 : f32 to vector<2x32xf32>
    %454 = arith.addf %453, %452 : vector<2x32xf32>
    %455 = arith.divf %453, %454 : vector<2x32xf32>
    %456 = arith.mulf %443, %411 : vector<2x32xf32>
    %457 = arith.mulf %435, %447 : vector<2x32xf32>
    %458 = arith.addf %456, %457 : vector<2x32xf32>
    %459 = math.tanh %458 : vector<2x32xf32>
    %460 = arith.mulf %455, %459 : vector<2x32xf32>
    %c0_251 = arith.constant 0 : index
    %c0_252 = arith.constant 0 : index
    %461 = vector.load %arg6[%c0_251, %c0_252] : memref<2x32xf32, #tpu.memory_space<vmem>>, vector<2x32xf32>
    tpu.vector_store %arg6[%c0_251, %c0_252], %460 {strides = array<i32>} : memref<2x32xf32, #tpu.memory_space<vmem>>, vector<2x32xf32>,
    %c0_253 = arith.constant 0 : index
    %c0_254 = arith.constant 0 : index
    %462 = vector.load %arg7[%c0_253, %c0_254] : memref<2x32xf32, #tpu.memory_space<vmem>>, vector<2x32xf32>
    tpu.vector_store %arg7[%c0_253, %c0_254], %458 {strides = array<i32>} : memref<2x32xf32, #tpu.memory_space<vmem>>, vector<2x32xf32>,
    %463 = math.tanh %460 : vector<2x32xf32>
    %464 = arith.index_cast %c7_i32 : i32 to index
    %c0_255 = arith.constant 0 : index
    %c0_256 = arith.constant 0 : index
    %465 = vector.load %arg3[%464, %c0_255, %c0_256] : memref<8x2x32xf32, #tpu.memory_space<vmem>>, vector<1x2x32xf32>
    %466 = vector.shape_cast %465 : vector<1x2x32xf32> to vector<2x32xf32>
    %467 = vector.shape_cast %463 : vector<2x32xf32> to vector<1x2x32xf32>
    tpu.vector_store %arg3[%464, %c0_255, %c0_256], %467 {strides = array<i32>} : memref<8x2x32xf32, #tpu.memory_space<vmem>>, vector<1x2x32xf32>,
    %c8_i32 = arith.constant 8 : i32
    %c0_257 = arith.constant 0 : index
    %c0_258 = arith.constant 0 : index
    %468 = vector.load %arg6[%c0_257, %c0_258] : memref<2x32xf32, #tpu.memory_space<vmem>>, vector<2x32xf32>
    %c0_259 = arith.constant 0 : index
    %c0_260 = arith.constant 0 : index
    %469 = vector.load %arg4[%c0_259, %c0_260] : memref<2x32xf32, #tpu.memory_space<vmem>>, vector<2x32xf32>
    tpu.vector_store %arg4[%c0_259, %c0_260], %468 {strides = array<i32>} : memref<2x32xf32, #tpu.memory_space<vmem>>, vector<2x32xf32>,
    %c0_261 = arith.constant 0 : index
    %c0_262 = arith.constant 0 : index
    %470 = vector.load %arg7[%c0_261, %c0_262] : memref<2x32xf32, #tpu.memory_space<vmem>>, vector<2x32xf32>
    %c0_263 = arith.constant 0 : index
    %c0_264 = arith.constant 0 : index
    %471 = vector.load %arg5[%c0_263, %c0_264] : memref<2x32xf32, #tpu.memory_space<vmem>>, vector<2x32xf32>
    tpu.vector_store %arg5[%c0_263, %c0_264], %470 {strides = array<i32>} : memref<2x32xf32, #tpu.memory_space<vmem>>, vector<2x32xf32>,
    return
  }
  func.func @transform_0(%arg0: i32) -> (i32, i32, i32, i32) {
    %c0_i32 = arith.constant 0 : i32
    %c0_i32_0 = arith.constant 0 : i32
    %c0_i32_1 = arith.constant 0 : i32
    %c0_i32_2 = arith.constant 0 : i32
    %c0_i32_3 = arith.constant 0 : i32
    return %c0_i32, %c0_i32_0, %c0_i32_1, %c0_i32_2 : i32, i32, i32, i32
  }
  func.func @transform_1(%arg0: i32) -> (i32, i32, i32) {
    %c0_i32 = arith.constant 0 : i32
    %c0_i32_0 = arith.constant 0 : i32
    %c0_i32_1 = arith.constant 0 : i32
    %c0_i32_2 = arith.constant 0 : i32
    return %c0_i32, %c0_i32_0, %c0_i32_1 : i32, i32, i32
  }
  func.func @transform_2(%arg0: i32) -> (i32, i32, i32) {
    %c0_i32 = arith.constant 0 : i32
    %c0_i32_0 = arith.constant 0 : i32
    %c0_i32_1 = arith.constant 0 : i32
    %c0_i32_2 = arith.constant 0 : i32
    return %c0_i32, %c0_i32_0, %c0_i32_1 : i32, i32, i32
  }
  func.func @transform_3(%arg0: i32) -> (i32, i32) {
    %c0_i32 = arith.constant 0 : i32
    %c0_i32_0 = arith.constant 0 : i32
    %c0_i32_1 = arith.constant 0 : i32
    return %c0_i32, %c0_i32_0 : i32, i32
  }
  func.func @transform_4(%arg0: i32) -> (i32, i32) {
    %c0_i32 = arith.constant 0 : i32
    %c0_i32_0 = arith.constant 0 : i32
    %c0_i32_1 = arith.constant 0 : i32
    return %c0_i32, %c0_i32_0 : i32, i32
  }
}

</mosaic_0001>

<bundles_post_ra>
// kernel: tpu_custom_call.1
= control target key start
LH: loop header
LB: loop body
LE: loop exit
PB: predicated region body
PF: predicated region fallthrough
CT: control target
= control target key end

     0   :  { %10 = vsyncpa [#allocation5], 0  ;;  %s3289_s0 = inlined_call_operand.hbm [shape: f32[8,4,2,32], index: 0, kind: input, shape index: {}]   ;;  %s3290_s1 = inlined_call_operand.hbm [shape: bf16[4,32,32], index: 1, kind: input, shape index: {}]   ;;  %s3291_s2 = inlined_call_operand.hbm [shape: f32[8,2,32], index: 2, kind: output, shape index: {0}]   ;;  %s3292_s3 = inlined_call_operand.hbm [shape: f32[2,32], index: 3, kind: output, shape index: {1}]   ;;  %s3293_s4 = inlined_call_operand.hbm [shape: f32[2,32], index: 4, kind: output, shape index: {2}]  }
   0x1   :  { %11 = vsyncpa [#allocation8], 0 }
   0x2   :  { %12 = vsyncpa [#allocation6], 0 }
   0x3   :  { %13 = vsyncpa [#allocation11], 0  ;;  %s3042_s15 = smov [#allocation4]  }
   0x4   :  { %s19_s16 = sshll.u32 %s3042_s15, 4  ;;  %s20_s16 = int_to_ptr.vmem [resolvable:$true] %s19_s16 }
   0x5   :  { %s2942_s17 = scalar_lea.vmem %s20_s16, 1024  ;;  %p2947_p1 = scmp.lt.s32.totalorder %s20_s16, %s20_s16 }
   0x6   :  { %p2943_p0 = scmp.ne.s32.totalorder %s20_s16, %s2942_s17  ;;  %p2948_p2 = scmp.lt.s32.totalorder %s2942_s17, %s2942_s17 }
   0x8   :  { %p2949_p3 = por %p2948_p2, %p2947_p1 }
   0xa   :  { %p2950_p4 = pnand %p2949_p3, %p2943_p0 }
   0xc   :  { %2953 = shalt.err (!%p2950_p4)
}
   0xd   :  { %s3043_s18 = smov 32   ;;  %s3044_s19 = smov 2  }
   0xe   :  { %25 = dma.hbm_to_vmem [thread:$0]  %s3289_s0, 1024, %s20_s16, [#allocation5], %s3043_s18, %s3043_s18, %s3044_s19  }
   0xf   :  { %s3045_s22 = smov [#allocation7]  }
  0x10   :  { %s31_s23 = sshll.u32 %s3045_s22, 4  ;;  %s32_s23 = int_to_ptr.vmem [resolvable:$true] %s31_s23 }
  0x11   :  { %s2962_s24 = scalar_lea.vmem %s32_s23, 1024  ;;  %p2967_p6 = scmp.lt.s32.totalorder %s32_s23, %s32_s23 }
  0x12   :  { %p2963_p5 = scmp.ne.s32.totalorder %s32_s23, %s2962_s24  ;;  %p2968_p7 = scmp.lt.s32.totalorder %s2962_s24, %s2962_s24 }
  0x14   :  { %p2969_p8 = por %p2968_p7, %p2967_p6 }
  0x16   :  { %p2970_p9 = pnand %p2969_p8, %p2963_p5 }
  0x18   :  { %2973 = shalt.err (!%p2970_p9)
}
  0x19   :  { %s3046_s25 = smov 64   ;;  %s3047_s26 = smov 4  }
  0x1a   :  { %37 = dma.hbm_to_vmem [thread:$0]  %s3290_s1, 1024, %s32_s23, [#allocation8], %s3046_s25, %s3046_s25, %s3047_s26  }
  0x1b   :  { %3034 = dma.done.wait [#allocation5], 1024  }
  0x1c   :  { %3035 = vsyncadd [#allocation5], 4294966272 }
  0x1d   :  { %3036 = dma.done.wait [#allocation8], 1024  }
  0x1e   :  { %3037 = vsyncadd [#allocation8], 4294966272  ;;  %vm45_vm0 = vcmask 254976   ;;  %v3048_v0 = vmov 0.0   ;;  %vm3049_vm1 = vmmov 0   ;;  %v2726_v1 = vld [vmem:[#allocation7 + $0x8] sm:$0xff]  }
  0x1f   :  { %2459 = vmatprep.subr.bf16.mxu0 %v3048_v0  ;;  %2467 = vmatprep.subr.bf16.mxu1 %v3048_v0  ;;  %46 = vst.msk [vmem:[#allocation2] sm:$0x3] %vm45_vm0, %v3048_v0  ;;  %47 = vst.msk [vmem:[#allocation3] sm:$0x3] %vm45_vm0, %v3048_v0  ;;  %v2727_v2 = vld [vmem:[#allocation7 + $0x18] sm:$0xff]   ;;  %v2728_v3 = vld [vmem:[#allocation7] sm:$0xff]  }
  0x20   :  { %2463 = vmatprep.mubr.msk.bf16.mxu0 %vm3049_vm1, %v3048_v0  ;;  %2471 = vmatprep.mubr.msk.bf16.mxu1 %vm3049_vm1, %v3048_v0  ;;  %v2729_v4 = vld [vmem:[#allocation7 + $0x10] sm:$0xff]   ;;  %vm67_vm2 = vcmask 261120   ;;  %v2730_v7 = vld [vmem:[#allocation7 + $0x28] sm:$0xff]   ;;  %v2731_v8 = vld [vmem:[#allocation7 + $0x38] sm:$0xff]   ;;  %s3050_s0 = smov [#allocation10]   ;;  %s3051_s29 = smov [#allocation12]  }
  0x21   :  { %2460 = vmatpush3.bf16.msra.mxu0 %v2726_v1  ;;  %2468 = vmatpush3.bf16.msra.mxu1 %v2727_v2  ;;  %v2732_v9 = vld [vmem:[#allocation7 + $0x20] sm:$0xff]   ;;  %v2733_v10 = vld [vmem:[#allocation7 + $0x30] sm:$0xff]   ;;  %v2734_v11 = vld [vmem:[#allocation7 + $0x8] sm:$0xff]   ;;  %s2216_s1 = sshll.u32 %s3050_s0, 4  ;;  %s2226_s30 = sshll.u32 %s3051_s29, 4  ;;  %s2217_s1 = int_to_ptr.vmem [resolvable:$true] %s2216_s1  ;;  %s2227_s30 = int_to_ptr.vmem [resolvable:$true] %s2226_s30 }
  0x22   :  { %2461 = vmatprep.subr.bf16.mxu0 %v3048_v0  ;;  %2469 = vmatprep.subr.bf16.mxu1 %v3048_v0  ;;  %v2735_v12 = vld [vmem:[#allocation7 + $0x18] sm:$0xff]   ;;  %v2736_v13 = vld [vmem:[#allocation7] sm:$0xff]   ;;  %v2737_v14 = vld [vmem:[#allocation7 + $0x10] sm:$0xff]   ;;  %s3052_s5 = smov [#allocation9]   ;;  %s2974_s7 = scalar_lea.vmem %s2217_s1, 32 }
  0x23   :  { %v282_v15 = vld [vmem:[#allocation4] sm:$0x3]  ;;  %v283_v16 = vld [vmem:[#allocation4 + $0x2] sm:$0x3]  ;;  %v285_v29 = vld [vmem:[#allocation4 + $0x6] sm:$0x3]  ;;  %p2975_p10 = scmp.ne.s32.totalorder %s2217_s1, %s2974_s7  ;;  %p2979_p11 = scmp.lt.s32.totalorder %s2217_s1, %s2217_s1 }
  0x24   :  { %v284_v35 = vld [vmem:[#allocation4 + $0x4] sm:$0x3]  ;;  %v2738_v59 = vld [vmem:[#allocation7 + $0x28] sm:$0xff]   ;;  %v2739_v60 = vld [vmem:[#allocation7 + $0x38] sm:$0xff]   ;;  %s2203_s6 = sshll.u32 %s3052_s5, 4  ;;  %p2980_p12 = scmp.lt.s32.totalorder %s2974_s7, %s2974_s7  ;;  %s2204_s6 = int_to_ptr.vmem [resolvable:$true] %s2203_s6 }
  0x25   :  { %2462 = vmatpush3.bf16.msra.mxu0 %v2728_v3  ;;  %2470 = vmatpush3.bf16.msra.mxu1 %v2729_v4  ;;  %v2740_v62 = vld [vmem:[#allocation7 + $0x20] sm:$0xff]   ;;  %v2741_v63 = vld [vmem:[#allocation7 + $0x30] sm:$0xff]   ;;  %v2742_v2 = vld [vmem:[#allocation7 + $0x8] sm:$0xff]  }
  0x26   :  { %v48_v5 = vld [vmem:[#allocation2] sm:$0x3]  ;;  %2475 = vmatprep.subr.bf16.mxu0 %v3048_v0  ;;  %2483 = vmatprep.subr.bf16.mxu1 %v3048_v0  ;;  %v49_v48 = vld [vmem:[#allocation3] sm:$0x3]  ;;  %v2744_v4 = vld [vmem:[#allocation7] sm:$0xff]   ;;  %p2981_p13 = por %p2980_p12, %p2979_p11 }
  0x27   :  { %v50_v6 = vpack.c.bf16 %v48_v5, %v48_v5  ;;  %v2743_v3 = vld [vmem:[#allocation7 + $0x18] sm:$0xff]   ;;  %v2745_v5 = vld [vmem:[#allocation7 + $0x10] sm:$0xff]  }
  0x28   :  { %p2982_p0 = pnand %p2981_p13, %p2975_p10 }
  0x29   :  { %2464 = vmatmul.mubr.msk.bf16.vlgmr.msra.gmra.mxu0 %vm67_vm2, %v50_v6  ;;  %2472 = vmatmul.mubr.msk.bf16.vlgmr.msra.gmra.mxu1 %vm67_vm2, %v50_v6 }
  0x2a   :  { %2476 = vmatpush3.bf16.msra.mxu0 %v2730_v7  ;;  %2484 = vmatpush3.bf16.msra.mxu1 %v2731_v8  ;;  %v550_v7 = vld [vmem:[#allocation4 + $0xa] sm:$0x3] }
  0x2b   :  { %2477 = vmatprep.subr.bf16.mxu0 %v3048_v0  ;;  %2485 = vmatprep.subr.bf16.mxu1 %v3048_v0 }
  0x2c   :  { %2479 = vmatprep.mubr.msk.bf16.mxu0 %vm3049_vm1, %v3048_v0  ;;  %2487 = vmatprep.mubr.msk.bf16.mxu1 %vm3049_vm1, %v3048_v0 }
  0x2e   :  { %2478 = vmatpush3.bf16.msra.mxu0 %v2732_v9  ;;  %2486 = vmatpush3.bf16.msra.mxu1 %v2733_v10 }
  0x2f   :  { %2491 = vmatprep.subr.bf16.mxu0 %v3048_v0  ;;  %2499 = vmatprep.subr.bf16.mxu1 %v3048_v0 }
  0x31   :  { %2480 = vmatmul.mubr.msk.bf16.vlgmr.msra.gmra.mxu0 %vm67_vm2, %v50_v6  ;;  %2488 = vmatmul.mubr.msk.bf16.vlgmr.msra.gmra.mxu1 %vm67_vm2, %v50_v6  ;;  %v549_v6 = vld [vmem:[#allocation4 + $0x8] sm:$0x3] }
  0x32   :  { %2495 = vmatprep.mubr.msk.bf16.mxu0 %vm3049_vm1, %v3048_v0  ;;  %2503 = vmatprep.mubr.msk.bf16.mxu1 %vm3049_vm1, %v3048_v0 }
  0x33   :  { %2492 = vmatpush3.bf16.msra.mxu0 %v2734_v11  ;;  %2500 = vmatpush3.bf16.msra.mxu1 %v2735_v12 }
  0x34   :  { %2493 = vmatprep.subr.bf16.mxu0 %v3048_v0  ;;  %2501 = vmatprep.subr.bf16.mxu1 %v3048_v0 }
  0x37   :  { %2494 = vmatpush3.bf16.msra.mxu0 %v2736_v13  ;;  %2502 = vmatpush3.bf16.msra.mxu1 %v2737_v14 }
  0x38   :  { %2507 = vmatprep.subr.bf16.mxu0 %v3048_v0  ;;  %2515 = vmatprep.subr.bf16.mxu1 %v3048_v0 }
  0xe9   :  { %v105_v17 = vpop.f32.mrf.mxu0  ;;  %v162_v19 = vpop.f32.mrf.mxu1 }
  0xea   :  { %v286_v18 = vadd.f32 %v282_v15, %v105_v17  ;;  %v293_v20 = vadd.f32 %v283_v16, %v162_v19 }
  0xeb   :  { %v2465_v21 = vpop.f32.mrf.mxu0  ;;  %v2473_v23 = vpop.f32.mrf.mxu1 }
  0xec   :  { %v2255_v22 = vmul.f32 -1.442695, %v286_v18  ;;  %v2256_v24 = vmul.f32 -1.442695, %v293_v20 }
  0xed   :  { %v108_v25 = vpop.f32.mrf.mxu0  ;;  %v165_v26 = vpop.f32.mrf.mxu1 }
  0xee   :  { %2790 = vpow2.f32 %v2255_v22  ;;  %v552_v22 = vld [vmem:[#allocation4 + $0xe] sm:$0x3] }
  0xef   :  { %2792 = vpow2.f32 %v2256_v24  ;;  %v2466_v27 = vpop.f32.mrf.mxu0  ;;  %v2474_v28 = vpop.f32.mrf.mxu1 }
  0xf0   :  { %v551_v28 = vld [vmem:[#allocation4 + $0xc] sm:$0x3] }
  0xf1   :  { %v219_v30 = vpop.f32.mrf.mxu0  ;;  %v276_v31 = vpop.f32.mrf.mxu1 }
  0xf2   :  { %v302_v32 = vadd.f32 %v285_v29, %v276_v31  ;;  %v300_v40 = vadd.f32 %v284_v35, %v219_v30 }
  0xf3   :  { %v2481_v33 = vpop.f32.mrf.mxu0  ;;  %v2489_v34 = vpop.f32.mrf.mxu1 }
  0xf4   :  { %v2257_v38 = vmul.f32 -1.442695, %v302_v32 }
  0xf5   :  { %v222_v36 = vpop.f32.mrf.mxu0  ;;  %v279_v37 = vpop.f32.mrf.mxu1 }
  0xf6   :  { %2794 = vpow2.f32 %v2257_v38 }
  0xf7   :  { %v2482_v39 = vpop.f32.mrf.mxu0  ;;  %v2490_v41 = vpop.f32.mrf.mxu1  ;;  %2796 = vtanh.f32 %v300_v40 }
  0xfb   :  { %v2791_v42 = vpop.eup %2790 }
  0xfc   :  { %v2793_v43 = vpop.eup %2792  ;;  %v290_v44 = vadd.f32 1.0, %v2791_v42 }
  0xfd   :  { %v297_v45 = vadd.f32 1.0, %v2793_v43 }
  0xfe   :  { %2798 = vrcp.f32 %v290_v44 }
  0xff   :  { %2800 = vrcp.f32 %v297_v45 }
 0x103   :  { %v2795_v46 = vpop.eup %2794 }
 0x104   :  { %v2797_v47 = vpop.eup %2796  ;;  %v306_v50 = vadd.f32 1.0, %v2795_v46 }
 0x106   :  { %2802 = vrcp.f32 %v306_v50  ;;  %v2746_v50 = vld [vmem:[#allocation7 + $0x28] sm:$0xff]  }
 0x10b   :  { %v2799_v49 = vpop.eup %2798 }
 0x10c   :  { %v2801_v51 = vpop.eup %2800  ;;  %v310_v52 = vmul.f32 %v2799_v49, %v2797_v47 }
 0x10d   :  { %v309_v53 = vmul.f32 %v2801_v51, %v49_v48  ;;  %v2747_v51 = vld [vmem:[#allocation7 + $0x38] sm:$0xff]  }
 0x10f   :  { %v311_v54 = vadd.f32 %v310_v52, %v309_v53  ;;  %v2748_v53 = vld [vmem:[#allocation7 + $0x20] sm:$0xff]  }
 0x111   :  { %2804 = vtanh.f32 %v311_v54  ;;  %315 = vst.msk [vmem:[#allocation3] sm:$0x3] %vm45_vm0, %v311_v54  ;;  %v2749_v54 = vld [vmem:[#allocation7 + $0x30] sm:$0xff]  }
 0x113   :  { %v2803_v55 = vpop.eup %2802 }
 0x118   :  { %v319_v41 = vld [vmem:[#allocation3] sm:$0x3] }
 0x11e   :  { %v2805_v56 = vpop.eup %2804 }
 0x11f   :  { %v313_v57 = vmul.f32 %v2805_v56, %v2803_v55  ;;  %v2750_v56 = vld [vmem:[#allocation7 + $0x8] sm:$0xff]  }
 0x121   :  { %314 = vst.msk [vmem:[#allocation2] sm:$0x3] %vm45_vm0, %v313_v57  ;;  %2806 = vtanh.f32 %v313_v57  ;;  %v2751_v57 = vld [vmem:[#allocation7 + $0x18] sm:$0xff]  }
 0x128   :  { %v318_v58 = vld [vmem:[#allocation2] sm:$0x3] }
 0x129   :  { %v320_v61 = vpack.c.bf16 %v318_v58, %v318_v58  ;;  %v2752_v58 = vld [vmem:[#allocation7] sm:$0xff]  }
 0x12b   :  { %2496 = vmatmul.mubr.msk.bf16.vlgmr.msra.gmra.mxu0 %vm67_vm2, %v320_v61  ;;  %2504 = vmatmul.mubr.msk.bf16.vlgmr.msra.gmra.mxu1 %vm67_vm2, %v320_v61 }
 0x12c   :  { %2508 = vmatpush3.bf16.msra.mxu0 %v2738_v59  ;;  %2516 = vmatpush3.bf16.msra.mxu1 %v2739_v60  ;;  %v2753_v59 = vld [vmem:[#allocation7 + $0x10] sm:$0xff]  }
 0x12d   :  { %2509 = vmatprep.subr.bf16.mxu0 %v3048_v0  ;;  %2517 = vmatprep.subr.bf16.mxu1 %v3048_v0  ;;  %v817_v60 = vld [vmem:[#allocation4 + $0x10] sm:$0x3] }
 0x12e   :  { %v2807_v1 = vpop.eup %2806  ;;  %2511 = vmatprep.mubr.msk.bf16.mxu0 %vm3049_vm1, %v3048_v0  ;;  %2519 = vmatprep.mubr.msk.bf16.mxu1 %vm3049_vm1, %v3048_v0 }
 0x12f   :  { %317 = vst.msk [vmem:[#allocation9] sm:$0x3] %vm45_vm0, %v2807_v1 }
 0x130   :  { %2510 = vmatpush3.bf16.msra.mxu0 %v2740_v62  ;;  %2518 = vmatpush3.bf16.msra.mxu1 %v2741_v63 }
 0x131   :  { %2523 = vmatprep.subr.bf16.mxu0 %v3048_v0  ;;  %2531 = vmatprep.subr.bf16.mxu1 %v3048_v0 }
 0x133   :  { %2512 = vmatmul.mubr.msk.bf16.vlgmr.msra.gmra.mxu0 %vm67_vm2, %v320_v61  ;;  %2520 = vmatmul.mubr.msk.bf16.vlgmr.msra.gmra.mxu1 %vm67_vm2, %v320_v61  ;;  %v818_v61 = vld [vmem:[#allocation4 + $0x12] sm:$0x3] }
 0x134   :  { %2527 = vmatprep.mubr.msk.bf16.mxu0 %vm3049_vm1, %v3048_v0  ;;  %2535 = vmatprep.mubr.msk.bf16.mxu1 %vm3049_vm1, %v3048_v0 }
 0x135   :  { %2524 = vmatpush3.bf16.msra.mxu0 %v2742_v2  ;;  %2532 = vmatpush3.bf16.msra.mxu1 %v2743_v3 }
 0x136   :  { %2525 = vmatprep.subr.bf16.mxu0 %v3048_v0  ;;  %2533 = vmatprep.subr.bf16.mxu1 %v3048_v0 }
 0x139   :  { %2526 = vmatpush3.bf16.msra.mxu0 %v2744_v4  ;;  %2534 = vmatpush3.bf16.msra.mxu1 %v2745_v5 }
 0x13a   :  { %2539 = vmatprep.subr.bf16.mxu0 %v3048_v0  ;;  %2547 = vmatprep.subr.bf16.mxu1 %v3048_v0 }
 0x1eb   :  { %v374_v8 = vpop.f32.mrf.mxu0  ;;  %v430_v9 = vpop.f32.mrf.mxu1 }
 0x1ec   :  { %v553_v10 = vadd.f32 %v549_v6, %v374_v8  ;;  %v560_v11 = vadd.f32 %v550_v7, %v430_v9 }
 0x1ed   :  { %v2497_v12 = vpop.f32.mrf.mxu0  ;;  %v2505_v13 = vpop.f32.mrf.mxu1 }
 0x1ee   :  { %v2270_v14 = vmul.f32 -1.442695, %v553_v10  ;;  %v2271_v15 = vmul.f32 -1.442695, %v560_v11  ;;  %v820_v13 = vld [vmem:[#allocation4 + $0x16] sm:$0x3] }
 0x1ef   :  { %v377_v16 = vpop.f32.mrf.mxu0  ;;  %v433_v17 = vpop.f32.mrf.mxu1 }
 0x1f0   :  { %2808 = vpow2.f32 %v2270_v14 }
 0x1f1   :  { %2810 = vpow2.f32 %v2271_v15  ;;  %v2498_v18 = vpop.f32.mrf.mxu0  ;;  %v2506_v19 = vpop.f32.mrf.mxu1 }
 0x1f2   :  { %v819_v19 = vld [vmem:[#allocation4 + $0x14] sm:$0x3] }
 0x1f3   :  { %v486_v20 = vpop.f32.mrf.mxu0  ;;  %v542_v21 = vpop.f32.mrf.mxu1 }
 0x1f4   :  { %v569_v25 = vadd.f32 %v552_v22, %v542_v21  ;;  %v567_v32 = vadd.f32 %v551_v28, %v486_v20 }
 0x1f5   :  { %v2513_v23 = vpop.f32.mrf.mxu0  ;;  %v2521_v24 = vpop.f32.mrf.mxu1 }
 0x1f6   :  { %v2272_v31 = vmul.f32 -1.442695, %v569_v25 }
 0x1f7   :  { %v489_v26 = vpop.f32.mrf.mxu0  ;;  %v545_v27 = vpop.f32.mrf.mxu1 }
 0x1f8   :  { %2812 = vpow2.f32 %v2272_v31 }
 0x1f9   :  { %v2514_v29 = vpop.f32.mrf.mxu0  ;;  %v2522_v30 = vpop.f32.mrf.mxu1  ;;  %2814 = vtanh.f32 %v567_v32 }
 0x1fd   :  { %v2809_v33 = vpop.eup %2808 }
 0x1fe   :  { %v2811_v34 = vpop.eup %2810  ;;  %v557_v35 = vadd.f32 1.0, %v2809_v33 }
 0x1ff   :  { %v564_v36 = vadd.f32 1.0, %v2811_v34 }
 0x200   :  { %2816 = vrcp.f32 %v557_v35 }
 0x201   :  { %2818 = vrcp.f32 %v564_v36 }
 0x205   :  { %v2813_v37 = vpop.eup %2812 }
 0x206   :  { %v2815_v38 = vpop.eup %2814  ;;  %v573_v43 = vadd.f32 1.0, %v2813_v37 }
 0x208   :  { %2820 = vrcp.f32 %v573_v43 }
 0x20d   :  { %v2817_v39 = vpop.eup %2816 }
 0x20e   :  { %v2819_v40 = vpop.eup %2818  ;;  %v577_v42 = vmul.f32 %v2817_v39, %v2815_v38 }
 0x20f   :  { %v576_v44 = vmul.f32 %v2819_v40, %v319_v41  ;;  %v2754_v41 = vld [vmem:[#allocation7 + $0x28] sm:$0xff]  }
 0x211   :  { %v578_v45 = vadd.f32 %v577_v42, %v576_v44  ;;  %v2755_v42 = vld [vmem:[#allocation7 + $0x38] sm:$0xff]   ;;  %v2756_v44 = vld [vmem:[#allocation7 + $0x20] sm:$0xff]  }
 0x213   :  { %2822 = vtanh.f32 %v578_v45  ;;  %582 = vst.msk [vmem:[#allocation3] sm:$0x3] %vm45_vm0, %v578_v45  ;;  %v2757_v45 = vld [vmem:[#allocation7 + $0x30] sm:$0xff]  }
 0x215   :  { %v2821_v46 = vpop.eup %2820 }
 0x21a   :  { %v587_v32 = vld [vmem:[#allocation3] sm:$0x3] }
 0x220   :  { %v2823_v47 = vpop.eup %2822 }
 0x221   :  { %v580_v48 = vmul.f32 %v2823_v47, %v2821_v46  ;;  %v2758_v47 = vld [vmem:[#allocation7 + $0x8] sm:$0xff]  }
 0x223   :  { %581 = vst.msk [vmem:[#allocation2] sm:$0x3] %vm45_vm0, %v580_v48  ;;  %2824 = vtanh.f32 %v580_v48  ;;  %v2759_v48 = vld [vmem:[#allocation7 + $0x18] sm:$0xff]  }
 0x22a   :  { %v586_v49 = vld [vmem:[#allocation2] sm:$0x3] }
 0x22b   :  { %v588_v52 = vpack.c.bf16 %v586_v49, %v586_v49  ;;  %v2760_v49 = vld [vmem:[#allocation7] sm:$0xff]  }
 0x22d   :  { %2528 = vmatmul.mubr.msk.bf16.vlgmr.msra.gmra.mxu0 %vm67_vm2, %v588_v52  ;;  %2536 = vmatmul.mubr.msk.bf16.vlgmr.msra.gmra.mxu1 %vm67_vm2, %v588_v52 }
 0x22e   :  { %2540 = vmatpush3.bf16.msra.mxu0 %v2746_v50  ;;  %2548 = vmatpush3.bf16.msra.mxu1 %v2747_v51  ;;  %v2761_v50 = vld [vmem:[#allocation7 + $0x10] sm:$0xff]   ;;  %v1085_v51 = vld [vmem:[#allocation4 + $0x18] sm:$0x3] }
 0x22f   :  { %2541 = vmatprep.subr.bf16.mxu0 %v3048_v0  ;;  %2549 = vmatprep.subr.bf16.mxu1 %v3048_v0 }
 0x230   :  { %v2825_v55 = vpop.eup %2824  ;;  %2543 = vmatprep.mubr.msk.bf16.mxu0 %vm3049_vm1, %v3048_v0  ;;  %2551 = vmatprep.mubr.msk.bf16.mxu1 %vm3049_vm1, %v3048_v0 }
 0x231   :  { %585 = vst.msk [vmem:[#allocation9 + $0x2] sm:$0x3] %vm45_vm0, %v2825_v55 }
 0x232   :  { %2542 = vmatpush3.bf16.msra.mxu0 %v2748_v53  ;;  %2550 = vmatpush3.bf16.msra.mxu1 %v2749_v54 }
 0x233   :  { %2555 = vmatprep.subr.bf16.mxu0 %v3048_v0  ;;  %2563 = vmatprep.subr.bf16.mxu1 %v3048_v0 }
 0x235   :  { %2544 = vmatmul.mubr.msk.bf16.vlgmr.msra.gmra.mxu0 %vm67_vm2, %v588_v52  ;;  %2552 = vmatmul.mubr.msk.bf16.vlgmr.msra.gmra.mxu1 %vm67_vm2, %v588_v52  ;;  %v1086_v52 = vld [vmem:[#allocation4 + $0x1a] sm:$0x3] }
 0x236   :  { %2559 = vmatprep.mubr.msk.bf16.mxu0 %vm3049_vm1, %v3048_v0  ;;  %2567 = vmatprep.mubr.msk.bf16.mxu1 %vm3049_vm1, %v3048_v0 }
 0x237   :  { %2556 = vmatpush3.bf16.msra.mxu0 %v2750_v56  ;;  %2564 = vmatpush3.bf16.msra.mxu1 %v2751_v57 }
 0x238   :  { %2557 = vmatprep.subr.bf16.mxu0 %v3048_v0  ;;  %2565 = vmatprep.subr.bf16.mxu1 %v3048_v0 }
 0x23b   :  { %2558 = vmatpush3.bf16.msra.mxu0 %v2752_v58  ;;  %2566 = vmatpush3.bf16.msra.mxu1 %v2753_v59 }
 0x23c   :  { %2571 = vmatprep.subr.bf16.mxu0 %v3048_v0  ;;  %2579 = vmatprep.subr.bf16.mxu1 %v3048_v0 }
 0x2ed   :  { %v642_v62 = vpop.f32.mrf.mxu0  ;;  %v698_v63 = vpop.f32.mrf.mxu1 }
 0x2ee   :  { %v821_v1 = vadd.f32 %v817_v60, %v642_v62  ;;  %v828_v2 = vadd.f32 %v818_v61, %v698_v63 }
 0x2ef   :  { %v2529_v3 = vpop.f32.mrf.mxu0  ;;  %v2537_v4 = vpop.f32.mrf.mxu1 }
 0x2f0   :  { %v2285_v5 = vmul.f32 -1.442695, %v821_v1  ;;  %v2286_v6 = vmul.f32 -1.442695, %v828_v2  ;;  %v1088_v4 = vld [vmem:[#allocation4 + $0x1e] sm:$0x3] }
 0x2f1   :  { %v645_v7 = vpop.f32.mrf.mxu0  ;;  %v701_v8 = vpop.f32.mrf.mxu1 }
 0x2f2   :  { %2826 = vpow2.f32 %v2285_v5 }
 0x2f3   :  { %2828 = vpow2.f32 %v2286_v6  ;;  %v2530_v9 = vpop.f32.mrf.mxu0  ;;  %v2538_v10 = vpop.f32.mrf.mxu1 }
 0x2f4   :  { %v1087_v10 = vld [vmem:[#allocation4 + $0x1c] sm:$0x3] }
 0x2f5   :  { %v754_v11 = vpop.f32.mrf.mxu0  ;;  %v810_v12 = vpop.f32.mrf.mxu1 }
 0x2f6   :  { %v837_v16 = vadd.f32 %v820_v13, %v810_v12  ;;  %v835_v23 = vadd.f32 %v819_v19, %v754_v11 }
 0x2f7   :  { %v2545_v14 = vpop.f32.mrf.mxu0  ;;  %v2553_v15 = vpop.f32.mrf.mxu1 }
 0x2f8   :  { %v2287_v22 = vmul.f32 -1.442695, %v837_v16 }
 0x2f9   :  { %v757_v17 = vpop.f32.mrf.mxu0  ;;  %v813_v18 = vpop.f32.mrf.mxu1 }
 0x2fa   :  { %2830 = vpow2.f32 %v2287_v22 }
 0x2fb   :  { %v2546_v20 = vpop.f32.mrf.mxu0  ;;  %v2554_v21 = vpop.f32.mrf.mxu1  ;;  %2832 = vtanh.f32 %v835_v23 }
 0x2ff   :  { %v2827_v24 = vpop.eup %2826 }
 0x300   :  { %v2829_v25 = vpop.eup %2828  ;;  %v825_v26 = vadd.f32 1.0, %v2827_v24 }
 0x301   :  { %v832_v27 = vadd.f32 1.0, %v2829_v25 }
 0x302   :  { %2834 = vrcp.f32 %v825_v26 }
 0x303   :  { %2836 = vrcp.f32 %v832_v27 }
 0x307   :  { %v2831_v28 = vpop.eup %2830 }
 0x308   :  { %v2833_v29 = vpop.eup %2832  ;;  %v841_v34 = vadd.f32 1.0, %v2831_v28 }
 0x30a   :  { %2838 = vrcp.f32 %v841_v34 }
 0x30f   :  { %v2835_v30 = vpop.eup %2834 }
 0x310   :  { %v2837_v31 = vpop.eup %2836  ;;  %v845_v33 = vmul.f32 %v2835_v30, %v2833_v29 }
 0x311   :  { %v844_v35 = vmul.f32 %v2837_v31, %v587_v32  ;;  %v2762_v32 = vld [vmem:[#allocation7 + $0x28] sm:$0xff]  }
 0x313   :  { %v846_v36 = vadd.f32 %v845_v33, %v844_v35  ;;  %v2763_v33 = vld [vmem:[#allocation7 + $0x38] sm:$0xff]   ;;  %v2764_v35 = vld [vmem:[#allocation7 + $0x20] sm:$0xff]  }
 0x315   :  { %2840 = vtanh.f32 %v846_v36  ;;  %850 = vst.msk [vmem:[#allocation3] sm:$0x3] %vm45_vm0, %v846_v36  ;;  %v2765_v36 = vld [vmem:[#allocation7 + $0x30] sm:$0xff]  }
 0x317   :  { %v2839_v37 = vpop.eup %2838 }
 0x31c   :  { %v855_v23 = vld [vmem:[#allocation3] sm:$0x3] }
 0x322   :  { %v2841_v38 = vpop.eup %2840 }
 0x323   :  { %v848_v39 = vmul.f32 %v2841_v38, %v2839_v37  ;;  %v2766_v38 = vld [vmem:[#allocation7 + $0x8] sm:$0xff]  }
 0x325   :  { %849 = vst.msk [vmem:[#allocation2] sm:$0x3] %vm45_vm0, %v848_v39  ;;  %2842 = vtanh.f32 %v848_v39  ;;  %v2767_v39 = vld [vmem:[#allocation7 + $0x18] sm:$0xff]  }
 0x32c   :  { %v854_v40 = vld [vmem:[#allocation2] sm:$0x3] }
 0x32d   :  { %v856_v43 = vpack.c.bf16 %v854_v40, %v854_v40  ;;  %v2768_v40 = vld [vmem:[#allocation7] sm:$0xff]  }
 0x32f   :  { %2560 = vmatmul.mubr.msk.bf16.vlgmr.msra.gmra.mxu0 %vm67_vm2, %v856_v43  ;;  %2568 = vmatmul.mubr.msk.bf16.vlgmr.msra.gmra.mxu1 %vm67_vm2, %v856_v43 }
 0x330   :  { %2572 = vmatpush3.bf16.msra.mxu0 %v2754_v41  ;;  %2580 = vmatpush3.bf16.msra.mxu1 %v2755_v42  ;;  %v2769_v41 = vld [vmem:[#allocation7 + $0x10] sm:$0xff]   ;;  %v1353_v42 = vld [vmem:[#allocation4 + $0x20] sm:$0x3] }
 0x331   :  { %2573 = vmatprep.subr.bf16.mxu0 %v3048_v0  ;;  %2581 = vmatprep.subr.bf16.mxu1 %v3048_v0 }
 0x332   :  { %v2843_v46 = vpop.eup %2842  ;;  %2575 = vmatprep.mubr.msk.bf16.mxu0 %vm3049_vm1, %v3048_v0  ;;  %2583 = vmatprep.mubr.msk.bf16.mxu1 %vm3049_vm1, %v3048_v0 }
 0x333   :  { %853 = vst.msk [vmem:[#allocation9 + $0x4] sm:$0x3] %vm45_vm0, %v2843_v46 }
 0x334   :  { %2574 = vmatpush3.bf16.msra.mxu0 %v2756_v44  ;;  %2582 = vmatpush3.bf16.msra.mxu1 %v2757_v45 }
 0x335   :  { %2587 = vmatprep.subr.bf16.mxu0 %v3048_v0  ;;  %2595 = vmatprep.subr.bf16.mxu1 %v3048_v0 }
 0x337   :  { %2576 = vmatmul.mubr.msk.bf16.vlgmr.msra.gmra.mxu0 %vm67_vm2, %v856_v43  ;;  %2584 = vmatmul.mubr.msk.bf16.vlgmr.msra.gmra.mxu1 %vm67_vm2, %v856_v43  ;;  %v1354_v43 = vld [vmem:[#allocation4 + $0x22] sm:$0x3] }
 0x338   :  { %2591 = vmatprep.mubr.msk.bf16.mxu0 %vm3049_vm1, %v3048_v0  ;;  %2599 = vmatprep.mubr.msk.bf16.mxu1 %vm3049_vm1, %v3048_v0 }
 0x339   :  { %2588 = vmatpush3.bf16.msra.mxu0 %v2758_v47  ;;  %2596 = vmatpush3.bf16.msra.mxu1 %v2759_v48 }
 0x33a   :  { %2589 = vmatprep.subr.bf16.mxu0 %v3048_v0  ;;  %2597 = vmatprep.subr.bf16.mxu1 %v3048_v0 }
 0x33d   :  { %2590 = vmatpush3.bf16.msra.mxu0 %v2760_v49  ;;  %2598 = vmatpush3.bf16.msra.mxu1 %v2761_v50 }
 0x33e   :  { %2603 = vmatprep.subr.bf16.mxu0 %v3048_v0  ;;  %2611 = vmatprep.subr.bf16.mxu1 %v3048_v0 }
 0x3ef   :  { %v910_v53 = vpop.f32.mrf.mxu0  ;;  %v966_v54 = vpop.f32.mrf.mxu1 }
 0x3f0   :  { %v1089_v55 = vadd.f32 %v1085_v51, %v910_v53  ;;  %v1096_v56 = vadd.f32 %v1086_v52, %v966_v54 }
 0x3f1   :  { %v2561_v57 = vpop.f32.mrf.mxu0  ;;  %v2569_v58 = vpop.f32.mrf.mxu1 }
 0x3f2   :  { %v2300_v59 = vmul.f32 -1.442695, %v1089_v55  ;;  %v2301_v60 = vmul.f32 -1.442695, %v1096_v56  ;;  %v1356_v58 = vld [vmem:[#allocation4 + $0x26] sm:$0x3] }
 0x3f3   :  { %v913_v61 = vpop.f32.mrf.mxu0  ;;  %v969_v62 = vpop.f32.mrf.mxu1 }
 0x3f4   :  { %2844 = vpow2.f32 %v2300_v59 }
 0x3f5   :  { %2846 = vpow2.f32 %v2301_v60  ;;  %v2562_v63 = vpop.f32.mrf.mxu0  ;;  %v2570_v1 = vpop.f32.mrf.mxu1 }
 0x3f6   :  { %v1355_v1 = vld [vmem:[#allocation4 + $0x24] sm:$0x3] }
 0x3f7   :  { %v1022_v2 = vpop.f32.mrf.mxu0  ;;  %v1078_v3 = vpop.f32.mrf.mxu1 }
 0x3f8   :  { %v1105_v7 = vadd.f32 %v1088_v4, %v1078_v3  ;;  %v1103_v14 = vadd.f32 %v1087_v10, %v1022_v2 }
 0x3f9   :  { %v2577_v5 = vpop.f32.mrf.mxu0  ;;  %v2585_v6 = vpop.f32.mrf.mxu1 }
 0x3fa   :  { %v2302_v13 = vmul.f32 -1.442695, %v1105_v7 }
 0x3fb   :  { %v1025_v8 = vpop.f32.mrf.mxu0  ;;  %v1081_v9 = vpop.f32.mrf.mxu1 }
 0x3fc   :  { %2848 = vpow2.f32 %v2302_v13 }
 0x3fd   :  { %v2578_v11 = vpop.f32.mrf.mxu0  ;;  %v2586_v12 = vpop.f32.mrf.mxu1  ;;  %2850 = vtanh.f32 %v1103_v14 }
 0x401   :  { %v2845_v15 = vpop.eup %2844 }
 0x402   :  { %v2847_v16 = vpop.eup %2846  ;;  %v1093_v17 = vadd.f32 1.0, %v2845_v15 }
 0x403   :  { %v1100_v18 = vadd.f32 1.0, %v2847_v16 }
 0x404   :  { %2852 = vrcp.f32 %v1093_v17 }
 0x405   :  { %2854 = vrcp.f32 %v1100_v18 }
 0x409   :  { %v2849_v19 = vpop.eup %2848 }
 0x40a   :  { %v2851_v20 = vpop.eup %2850  ;;  %v1109_v25 = vadd.f32 1.0, %v2849_v19 }
 0x40c   :  { %2856 = vrcp.f32 %v1109_v25 }
 0x411   :  { %v2853_v21 = vpop.eup %2852 }
 0x412   :  { %v2855_v22 = vpop.eup %2854  ;;  %v1113_v24 = vmul.f32 %v2853_v21, %v2851_v20 }
 0x413   :  { %v1112_v26 = vmul.f32 %v2855_v22, %v855_v23  ;;  %v2770_v23 = vld [vmem:[#allocation7 + $0x28] sm:$0xff]  }
 0x415   :  { %v1114_v27 = vadd.f32 %v1113_v24, %v1112_v26  ;;  %v2771_v24 = vld [vmem:[#allocation7 + $0x38] sm:$0xff]   ;;  %v2772_v26 = vld [vmem:[#allocation7 + $0x20] sm:$0xff]  }
 0x417   :  { %2858 = vtanh.f32 %v1114_v27  ;;  %1118 = vst.msk [vmem:[#allocation3] sm:$0x3] %vm45_vm0, %v1114_v27  ;;  %v2773_v27 = vld [vmem:[#allocation7 + $0x30] sm:$0xff]  }
 0x419   :  { %v2857_v28 = vpop.eup %2856 }
 0x41e   :  { %v1123_v14 = vld [vmem:[#allocation3] sm:$0x3] }
 0x424   :  { %v2859_v29 = vpop.eup %2858 }
 0x425   :  { %v1116_v30 = vmul.f32 %v2859_v29, %v2857_v28  ;;  %v2774_v29 = vld [vmem:[#allocation7 + $0x8] sm:$0xff]  }
 0x427   :  { %2860 = vtanh.f32 %v1116_v30  ;;  %1117 = vst.msk [vmem:[#allocation2] sm:$0x3] %vm45_vm0, %v1116_v30  ;;  %v2775_v30 = vld [vmem:[#allocation7 + $0x18] sm:$0xff]  }
 0x42e   :  { %v1122_v31 = vld [vmem:[#allocation2] sm:$0x3] }
 0x42f   :  { %v1124_v34 = vpack.c.bf16 %v1122_v31, %v1122_v31  ;;  %v2776_v31 = vld [vmem:[#allocation7] sm:$0xff]  }
 0x431   :  { %2592 = vmatmul.mubr.msk.bf16.vlgmr.msra.gmra.mxu0 %vm67_vm2, %v1124_v34  ;;  %2600 = vmatmul.mubr.msk.bf16.vlgmr.msra.gmra.mxu1 %vm67_vm2, %v1124_v34 }
 0x432   :  { %2604 = vmatpush3.bf16.msra.mxu0 %v2762_v32  ;;  %2612 = vmatpush3.bf16.msra.mxu1 %v2763_v33  ;;  %v2777_v32 = vld [vmem:[#allocation7 + $0x10] sm:$0xff]   ;;  %v1621_v33 = vld [vmem:[#allocation4 + $0x28] sm:$0x3] }
 0x433   :  { %2605 = vmatprep.subr.bf16.mxu0 %v3048_v0  ;;  %2613 = vmatprep.subr.bf16.mxu1 %v3048_v0 }
 0x434   :  { %v2861_v37 = vpop.eup %2860  ;;  %2607 = vmatprep.mubr.msk.bf16.mxu0 %vm3049_vm1, %v3048_v0  ;;  %2615 = vmatprep.mubr.msk.bf16.mxu1 %vm3049_vm1, %v3048_v0 }
 0x435   :  { %1121 = vst.msk [vmem:[#allocation9 + $0x6] sm:$0x3] %vm45_vm0, %v2861_v37 }
 0x436   :  { %2606 = vmatpush3.bf16.msra.mxu0 %v2764_v35  ;;  %2614 = vmatpush3.bf16.msra.mxu1 %v2765_v36 }
 0x437   :  { %2619 = vmatprep.subr.bf16.mxu0 %v3048_v0  ;;  %2627 = vmatprep.subr.bf16.mxu1 %v3048_v0 }
 0x439   :  { %2608 = vmatmul.mubr.msk.bf16.vlgmr.msra.gmra.mxu0 %vm67_vm2, %v1124_v34  ;;  %2616 = vmatmul.mubr.msk.bf16.vlgmr.msra.gmra.mxu1 %vm67_vm2, %v1124_v34  ;;  %v1622_v34 = vld [vmem:[#allocation4 + $0x2a] sm:$0x3] }
 0x43a   :  { %2623 = vmatprep.mubr.msk.bf16.mxu0 %vm3049_vm1, %v3048_v0  ;;  %2631 = vmatprep.mubr.msk.bf16.mxu1 %vm3049_vm1, %v3048_v0 }
 0x43b   :  { %2620 = vmatpush3.bf16.msra.mxu0 %v2766_v38  ;;  %2628 = vmatpush3.bf16.msra.mxu1 %v2767_v39 }
 0x43c   :  { %2621 = vmatprep.subr.bf16.mxu0 %v3048_v0  ;;  %2629 = vmatprep.subr.bf16.mxu1 %v3048_v0 }
 0x43f   :  { %2622 = vmatpush3.bf16.msra.mxu0 %v2768_v40  ;;  %2630 = vmatpush3.bf16.msra.mxu1 %v2769_v41 }
 0x440   :  { %2635 = vmatprep.subr.bf16.mxu0 %v3048_v0  ;;  %2643 = vmatprep.subr.bf16.mxu1 %v3048_v0 }
 0x4f1   :  { %v1178_v44 = vpop.f32.mrf.mxu0  ;;  %v1234_v45 = vpop.f32.mrf.mxu1 }
 0x4f2   :  { %v1357_v46 = vadd.f32 %v1353_v42, %v1178_v44  ;;  %v1364_v47 = vadd.f32 %v1354_v43, %v1234_v45 }
 0x4f3   :  { %v2593_v48 = vpop.f32.mrf.mxu0  ;;  %v2601_v49 = vpop.f32.mrf.mxu1 }
 0x4f4   :  { %v2315_v50 = vmul.f32 -1.442695, %v1357_v46  ;;  %v2316_v51 = vmul.f32 -1.442695, %v1364_v47  ;;  %v1624_v49 = vld [vmem:[#allocation4 + $0x2e] sm:$0x3] }
 0x4f5   :  { %v1181_v52 = vpop.f32.mrf.mxu0  ;;  %v1237_v53 = vpop.f32.mrf.mxu1 }
 0x4f6   :  { %2862 = vpow2.f32 %v2315_v50 }
 0x4f7   :  { %2864 = vpow2.f32 %v2316_v51  ;;  %v2594_v54 = vpop.f32.mrf.mxu0  ;;  %v2602_v55 = vpop.f32.mrf.mxu1 }
 0x4f8   :  { %v1623_v55 = vld [vmem:[#allocation4 + $0x2c] sm:$0x3] }
 0x4f9   :  { %v1290_v56 = vpop.f32.mrf.mxu0  ;;  %v1346_v57 = vpop.f32.mrf.mxu1 }
 0x4fa   :  { %v1373_v61 = vadd.f32 %v1356_v58, %v1346_v57  ;;  %v1371_v5 = vadd.f32 %v1355_v1, %v1290_v56 }
 0x4fb   :  { %v2609_v59 = vpop.f32.mrf.mxu0  ;;  %v2617_v60 = vpop.f32.mrf.mxu1 }
 0x4fc   :  { %v2317_v4 = vmul.f32 -1.442695, %v1373_v61 }
 0x4fd   :  { %v1293_v62 = vpop.f32.mrf.mxu0  ;;  %v1349_v63 = vpop.f32.mrf.mxu1 }
 0x4fe   :  { %2866 = vpow2.f32 %v2317_v4 }
 0x4ff   :  { %v2610_v2 = vpop.f32.mrf.mxu0  ;;  %v2618_v3 = vpop.f32.mrf.mxu1  ;;  %2868 = vtanh.f32 %v1371_v5 }
 0x503   :  { %v2863_v6 = vpop.eup %2862 }
 0x504   :  { %v2865_v7 = vpop.eup %2864  ;;  %v1361_v8 = vadd.f32 1.0, %v2863_v6 }
 0x505   :  { %v1368_v9 = vadd.f32 1.0, %v2865_v7 }
 0x506   :  { %2870 = vrcp.f32 %v1361_v8 }
 0x507   :  { %2872 = vrcp.f32 %v1368_v9 }
 0x50b   :  { %v2867_v10 = vpop.eup %2866 }
 0x50c   :  { %v2869_v11 = vpop.eup %2868  ;;  %v1377_v16 = vadd.f32 1.0, %v2867_v10 }
 0x50e   :  { %2874 = vrcp.f32 %v1377_v16 }
 0x513   :  { %v2871_v12 = vpop.eup %2870 }
 0x514   :  { %v2873_v13 = vpop.eup %2872  ;;  %v1381_v15 = vmul.f32 %v2871_v12, %v2869_v11 }
 0x515   :  { %v1380_v17 = vmul.f32 %v2873_v13, %v1123_v14  ;;  %v2778_v14 = vld [vmem:[#allocation7 + $0x28] sm:$0xff]  }
 0x517   :  { %v1382_v18 = vadd.f32 %v1381_v15, %v1380_v17  ;;  %v2779_v15 = vld [vmem:[#allocation7 + $0x38] sm:$0xff]   ;;  %v2780_v17 = vld [vmem:[#allocation7 + $0x20] sm:$0xff]  }
 0x519   :  { %2876 = vtanh.f32 %v1382_v18  ;;  %1386 = vst.msk [vmem:[#allocation3] sm:$0x3] %vm45_vm0, %v1382_v18  ;;  %v2781_v18 = vld [vmem:[#allocation7 + $0x30] sm:$0xff]  }
 0x51b   :  { %v2875_v19 = vpop.eup %2874 }
 0x520   :  { %v1391_v5 = vld [vmem:[#allocation3] sm:$0x3] }
 0x526   :  { %v2877_v20 = vpop.eup %2876 }
 0x527   :  { %v1384_v21 = vmul.f32 %v2877_v20, %v2875_v19  ;;  %v2782_v20 = vld [vmem:[#allocation7 + $0x8] sm:$0xff]  }
 0x529   :  { %2878 = vtanh.f32 %v1384_v21  ;;  %1385 = vst.msk [vmem:[#allocation2] sm:$0x3] %vm45_vm0, %v1384_v21  ;;  %v2783_v21 = vld [vmem:[#allocation7 + $0x18] sm:$0xff]  }
 0x530   :  { %v1390_v22 = vld [vmem:[#allocation2] sm:$0x3] }
 0x531   :  { %v1392_v25 = vpack.c.bf16 %v1390_v22, %v1390_v22  ;;  %v2784_v22 = vld [vmem:[#allocation7] sm:$0xff]  }
 0x533   :  { %2624 = vmatmul.mubr.msk.bf16.vlgmr.msra.gmra.mxu0 %vm67_vm2, %v1392_v25  ;;  %2632 = vmatmul.mubr.msk.bf16.vlgmr.msra.gmra.mxu1 %vm67_vm2, %v1392_v25 }
 0x534   :  { %2636 = vmatpush3.bf16.msra.mxu0 %v2770_v23  ;;  %2644 = vmatpush3.bf16.msra.mxu1 %v2771_v24  ;;  %v2785_v23 = vld [vmem:[#allocation7 + $0x10] sm:$0xff]  }
 0x535   :  { %2637 = vmatprep.subr.bf16.mxu0 %v3048_v0  ;;  %2645 = vmatprep.subr.bf16.mxu1 %v3048_v0  ;;  %v1889_v24 = vld [vmem:[#allocation4 + $0x30] sm:$0x3] }
 0x536   :  { %v2879_v28 = vpop.eup %2878  ;;  %2639 = vmatprep.mubr.msk.bf16.mxu0 %vm3049_vm1, %v3048_v0  ;;  %2647 = vmatprep.mubr.msk.bf16.mxu1 %vm3049_vm1, %v3048_v0 }
 0x537   :  { %1389 = vst.msk [vmem:[#allocation9 + $0x8] sm:$0x3] %vm45_vm0, %v2879_v28 }
 0x538   :  { %2638 = vmatpush3.bf16.msra.mxu0 %v2772_v26  ;;  %2646 = vmatpush3.bf16.msra.mxu1 %v2773_v27 }
 0x539   :  { %2651 = vmatprep.subr.bf16.mxu0 %v3048_v0  ;;  %2659 = vmatprep.subr.bf16.mxu1 %v3048_v0 }
 0x53b   :  { %2640 = vmatmul.mubr.msk.bf16.vlgmr.msra.gmra.mxu0 %vm67_vm2, %v1392_v25  ;;  %2648 = vmatmul.mubr.msk.bf16.vlgmr.msra.gmra.mxu1 %vm67_vm2, %v1392_v25  ;;  %v1890_v25 = vld [vmem:[#allocation4 + $0x32] sm:$0x3] }
 0x53c   :  { %2655 = vmatprep.mubr.msk.bf16.mxu0 %vm3049_vm1, %v3048_v0  ;;  %2663 = vmatprep.mubr.msk.bf16.mxu1 %vm3049_vm1, %v3048_v0 }
 0x53d   :  { %2652 = vmatpush3.bf16.msra.mxu0 %v2774_v29  ;;  %2660 = vmatpush3.bf16.msra.mxu1 %v2775_v30 }
 0x53e   :  { %2653 = vmatprep.subr.bf16.mxu0 %v3048_v0  ;;  %2661 = vmatprep.subr.bf16.mxu1 %v3048_v0 }
 0x541   :  { %2654 = vmatpush3.bf16.msra.mxu0 %v2776_v31  ;;  %2662 = vmatpush3.bf16.msra.mxu1 %v2777_v32 }
 0x542   :  { %2667 = vmatprep.subr.bf16.mxu0 %v3048_v0  ;;  %2675 = vmatprep.subr.bf16.mxu1 %v3048_v0 }
 0x5f3   :  { %v1446_v35 = vpop.f32.mrf.mxu0  ;;  %v1502_v36 = vpop.f32.mrf.mxu1 }
 0x5f4   :  { %v1625_v37 = vadd.f32 %v1621_v33, %v1446_v35  ;;  %v1632_v38 = vadd.f32 %v1622_v34, %v1502_v36 }
 0x5f5   :  { %v2625_v39 = vpop.f32.mrf.mxu0  ;;  %v2633_v40 = vpop.f32.mrf.mxu1 }
 0x5f6   :  { %v2330_v41 = vmul.f32 -1.442695, %v1625_v37  ;;  %v2331_v42 = vmul.f32 -1.442695, %v1632_v38  ;;  %v1892_v40 = vld [vmem:[#allocation4 + $0x36] sm:$0x3] }
 0x5f7   :  { %v1449_v43 = vpop.f32.mrf.mxu0  ;;  %v1505_v44 = vpop.f32.mrf.mxu1 }
 0x5f8   :  { %2880 = vpow2.f32 %v2330_v41 }
 0x5f9   :  { %2882 = vpow2.f32 %v2331_v42  ;;  %v2626_v45 = vpop.f32.mrf.mxu0  ;;  %v2634_v46 = vpop.f32.mrf.mxu1 }
 0x5fa   :  { %v1891_v46 = vld [vmem:[#allocation4 + $0x34] sm:$0x3] }
 0x5fb   :  { %v1558_v47 = vpop.f32.mrf.mxu0  ;;  %v1614_v48 = vpop.f32.mrf.mxu1 }
 0x5fc   :  { %v1641_v52 = vadd.f32 %v1624_v49, %v1614_v48  ;;  %v1639_v59 = vadd.f32 %v1623_v55, %v1558_v47 }
 0x5fd   :  { %v2641_v50 = vpop.f32.mrf.mxu0  ;;  %v2649_v51 = vpop.f32.mrf.mxu1 }
 0x5fe   :  { %v2332_v58 = vmul.f32 -1.442695, %v1641_v52 }
 0x5ff   :  { %v1561_v53 = vpop.f32.mrf.mxu0  ;;  %v1617_v54 = vpop.f32.mrf.mxu1 }
 0x600   :  { %2884 = vpow2.f32 %v2332_v58 }
 0x601   :  { %v2642_v56 = vpop.f32.mrf.mxu0  ;;  %v2650_v57 = vpop.f32.mrf.mxu1  ;;  %2886 = vtanh.f32 %v1639_v59 }
 0x605   :  { %v2881_v60 = vpop.eup %2880 }
 0x606   :  { %v2883_v61 = vpop.eup %2882  ;;  %v1629_v62 = vadd.f32 1.0, %v2881_v60 }
 0x607   :  { %v1636_v63 = vadd.f32 1.0, %v2883_v61 }
 0x608   :  { %2888 = vrcp.f32 %v1629_v62 }
 0x609   :  { %2890 = vrcp.f32 %v1636_v63 }
 0x60d   :  { %v2885_v1 = vpop.eup %2884 }
 0x60e   :  { %v2887_v2 = vpop.eup %2886  ;;  %v1645_v7 = vadd.f32 1.0, %v2885_v1 }
 0x610   :  { %2892 = vrcp.f32 %v1645_v7 }
 0x615   :  { %v2889_v3 = vpop.eup %2888 }
 0x616   :  { %v2891_v4 = vpop.eup %2890  ;;  %v1649_v6 = vmul.f32 %v2889_v3, %v2887_v2 }
 0x617   :  { %v1648_v8 = vmul.f32 %v2891_v4, %v1391_v5  ;;  %v2786_v5 = vld [vmem:[#allocation7 + $0x28] sm:$0xff]  }
 0x619   :  { %v1650_v9 = vadd.f32 %v1649_v6, %v1648_v8  ;;  %v2787_v6 = vld [vmem:[#allocation7 + $0x38] sm:$0xff]   ;;  %v2788_v8 = vld [vmem:[#allocation7 + $0x20] sm:$0xff]  }
 0x61b   :  { %2894 = vtanh.f32 %v1650_v9  ;;  %1654 = vst.msk [vmem:[#allocation3] sm:$0x3] %vm45_vm0, %v1650_v9  ;;  %v2789_v9 = vld [vmem:[#allocation7 + $0x30] sm:$0xff]  }
 0x61d   :  { %v2893_v10 = vpop.eup %2892 }
 0x622   :  { %v1659_v59 = vld [vmem:[#allocation3] sm:$0x3] }
 0x628   :  { %v2895_v11 = vpop.eup %2894 }
 0x629   :  { %v1652_v12 = vmul.f32 %v2895_v11, %v2893_v10  ;;  %v2157_v11 = vld [vmem:[#allocation4 + $0x38] sm:$0x3] }
 0x62b   :  { %2896 = vtanh.f32 %v1652_v12  ;;  %1653 = vst.msk [vmem:[#allocation2] sm:$0x3] %vm45_vm0, %v1652_v12  ;;  %v2158_v12 = vld [vmem:[#allocation4 + $0x3a] sm:$0x3] }
 0x632   :  { %v1658_v13 = vld [vmem:[#allocation2] sm:$0x3] }
 0x633   :  { %v1660_v16 = vpack.c.bf16 %v1658_v13, %v1658_v13 }
 0x635   :  { %2656 = vmatmul.mubr.msk.bf16.vlgmr.msra.gmra.mxu0 %vm67_vm2, %v1660_v16  ;;  %2664 = vmatmul.mubr.msk.bf16.vlgmr.msra.gmra.mxu1 %vm67_vm2, %v1660_v16 }
 0x636   :  { %2668 = vmatpush3.bf16.msra.mxu0 %v2778_v14  ;;  %2676 = vmatpush3.bf16.msra.mxu1 %v2779_v15 }
 0x637   :  { %2669 = vmatprep.subr.bf16.mxu0 %v3048_v0  ;;  %2677 = vmatprep.subr.bf16.mxu1 %v3048_v0 }
 0x638   :  { %v2897_v19 = vpop.eup %2896  ;;  %2671 = vmatprep.mubr.msk.bf16.mxu0 %vm3049_vm1, %v3048_v0  ;;  %2679 = vmatprep.mubr.msk.bf16.mxu1 %vm3049_vm1, %v3048_v0 }
 0x639   :  { %1657 = vst.msk [vmem:[#allocation9 + $0xa] sm:$0x3] %vm45_vm0, %v2897_v19 }
 0x63a   :  { %2670 = vmatpush3.bf16.msra.mxu0 %v2780_v17  ;;  %2678 = vmatpush3.bf16.msra.mxu1 %v2781_v18 }
 0x63b   :  { %2683 = vmatprep.subr.bf16.mxu0 %v3048_v0  ;;  %2691 = vmatprep.subr.bf16.mxu1 %v3048_v0 }
 0x63d   :  { %2672 = vmatmul.mubr.msk.bf16.vlgmr.msra.gmra.mxu0 %vm67_vm2, %v1660_v16  ;;  %2680 = vmatmul.mubr.msk.bf16.vlgmr.msra.gmra.mxu1 %vm67_vm2, %v1660_v16 }
 0x63e   :  { %2687 = vmatprep.mubr.msk.bf16.mxu0 %vm3049_vm1, %v3048_v0  ;;  %2695 = vmatprep.mubr.msk.bf16.mxu1 %vm3049_vm1, %v3048_v0 }
 0x63f   :  { %2684 = vmatpush3.bf16.msra.mxu0 %v2782_v20  ;;  %2692 = vmatpush3.bf16.msra.mxu1 %v2783_v21 }
 0x640   :  { %2685 = vmatprep.subr.bf16.mxu0 %v3048_v0  ;;  %2693 = vmatprep.subr.bf16.mxu1 %v3048_v0 }
 0x643   :  { %2686 = vmatpush3.bf16.msra.mxu0 %v2784_v22  ;;  %2694 = vmatpush3.bf16.msra.mxu1 %v2785_v23 }
 0x644   :  { %2699 = vmatprep.subr.bf16.mxu0 %v3048_v0  ;;  %2707 = vmatprep.subr.bf16.mxu1 %v3048_v0 }
 0x6f5   :  { %v1714_v26 = vpop.f32.mrf.mxu0  ;;  %v1770_v27 = vpop.f32.mrf.mxu1 }
 0x6f6   :  { %v1893_v28 = vadd.f32 %v1889_v24, %v1714_v26  ;;  %v1900_v29 = vadd.f32 %v1890_v25, %v1770_v27  ;;  %v2160_v26 = vld [vmem:[#allocation4 + $0x3e] sm:$0x3] }
 0x6f7   :  { %v2657_v30 = vpop.f32.mrf.mxu0  ;;  %v2665_v31 = vpop.f32.mrf.mxu1 }
 0x6f8   :  { %v2345_v32 = vmul.f32 -1.442695, %v1893_v28  ;;  %v2346_v33 = vmul.f32 -1.442695, %v1900_v29 }
 0x6f9   :  { %v1717_v34 = vpop.f32.mrf.mxu0  ;;  %v1773_v35 = vpop.f32.mrf.mxu1 }
 0x6fa   :  { %2898 = vpow2.f32 %v2345_v32  ;;  %v2159_v32 = vld [vmem:[#allocation4 + $0x3c] sm:$0x3] }
 0x6fb   :  { %2900 = vpow2.f32 %v2346_v33  ;;  %v2658_v36 = vpop.f32.mrf.mxu0  ;;  %v2666_v37 = vpop.f32.mrf.mxu1 }
 0x6fd   :  { %v1826_v38 = vpop.f32.mrf.mxu0  ;;  %v1882_v39 = vpop.f32.mrf.mxu1 }
 0x6fe   :  { %v1909_v43 = vadd.f32 %v1892_v40, %v1882_v39  ;;  %v1907_v50 = vadd.f32 %v1891_v46, %v1826_v38 }
 0x6ff   :  { %v2673_v41 = vpop.f32.mrf.mxu0  ;;  %v2681_v42 = vpop.f32.mrf.mxu1 }
 0x700   :  { %v2347_v49 = vmul.f32 -1.442695, %v1909_v43 }
 0x701   :  { %v1829_v44 = vpop.f32.mrf.mxu0  ;;  %v1885_v45 = vpop.f32.mrf.mxu1 }
 0x702   :  { %2902 = vpow2.f32 %v2347_v49 }
 0x703   :  { %v2674_v47 = vpop.f32.mrf.mxu0  ;;  %v2682_v48 = vpop.f32.mrf.mxu1  ;;  %2904 = vtanh.f32 %v1907_v50 }
 0x707   :  { %v2899_v51 = vpop.eup %2898 }
 0x708   :  { %v2901_v52 = vpop.eup %2900  ;;  %v1897_v53 = vadd.f32 1.0, %v2899_v51 }
 0x709   :  { %v1904_v54 = vadd.f32 1.0, %v2901_v52 }
 0x70a   :  { %2906 = vrcp.f32 %v1897_v53 }
 0x70b   :  { %2908 = vrcp.f32 %v1904_v54 }
 0x70f   :  { %v2903_v55 = vpop.eup %2902 }
 0x710   :  { %v2905_v56 = vpop.eup %2904  ;;  %v1913_v61 = vadd.f32 1.0, %v2903_v55 }
 0x712   :  { %2910 = vrcp.f32 %v1913_v61 }
 0x717   :  { %v2907_v57 = vpop.eup %2906 }
 0x718   :  { %v2909_v58 = vpop.eup %2908  ;;  %v1917_v60 = vmul.f32 %v2907_v57, %v2905_v56 }
 0x719   :  { %v1916_v62 = vmul.f32 %v2909_v58, %v1659_v59 }
 0x71b   :  { %v1918_v63 = vadd.f32 %v1917_v60, %v1916_v62 }
 0x71d   :  { %2912 = vtanh.f32 %v1918_v63  ;;  %1922 = vst.msk [vmem:[#allocation3] sm:$0x3] %vm45_vm0, %v1918_v63 }
 0x71f   :  { %v2911_v1 = vpop.eup %2910 }
 0x724   :  { %v1927_v45 = vld [vmem:[#allocation3] sm:$0x3] }
 0x72a   :  { %v2913_v2 = vpop.eup %2912 }
 0x72b   :  { %v1920_v3 = vmul.f32 %v2913_v2, %v2911_v1 }
 0x72d   :  { %2914 = vtanh.f32 %v1920_v3  ;;  %1921 = vst.msk [vmem:[#allocation2] sm:$0x3] %vm45_vm0, %v1920_v3 }
 0x734   :  { %v1926_v4 = vld [vmem:[#allocation2] sm:$0x3] }
 0x735   :  { %v1928_v7 = vpack.c.bf16 %v1926_v4, %v1926_v4 }
 0x737   :  { %2688 = vmatmul.mubr.msk.bf16.vlgmr.msra.gmra.mxu0 %vm67_vm2, %v1928_v7  ;;  %2696 = vmatmul.mubr.msk.bf16.vlgmr.msra.gmra.mxu1 %vm67_vm2, %v1928_v7 }
 0x738   :  { %2700 = vmatpush3.bf16.msra.mxu0 %v2786_v5  ;;  %2708 = vmatpush3.bf16.msra.mxu1 %v2787_v6 }
 0x739   :  { %2701 = vmatprep.subr.bf16.mxu0 %v3048_v0  ;;  %2709 = vmatprep.subr.bf16.mxu1 %v3048_v0 }
 0x73a   :  { %v2915_v10 = vpop.eup %2914  ;;  %2703 = vmatprep.mubr.msk.bf16.mxu0 %vm3049_vm1, %v3048_v0  ;;  %2711 = vmatprep.mubr.msk.bf16.mxu1 %vm3049_vm1, %v3048_v0 }
 0x73b   :  { %1925 = vst.msk [vmem:[#allocation9 + $0xc] sm:$0x3] %vm45_vm0, %v2915_v10 }
 0x73c   :  { %2702 = vmatpush3.bf16.msra.mxu0 %v2788_v8  ;;  %2710 = vmatpush3.bf16.msra.mxu1 %v2789_v9 }
 0x73f   :  { %2704 = vmatmul.mubr.msk.bf16.vlgmr.msra.gmra.mxu0 %vm67_vm2, %v1928_v7  ;;  %2712 = vmatmul.mubr.msk.bf16.vlgmr.msra.gmra.mxu1 %vm67_vm2, %v1928_v7 }
 0x7f7   :  { %v1982_v13 = vpop.f32.mrf.mxu0  ;;  %v2038_v14 = vpop.f32.mrf.mxu1 }
 0x7f8   :  { %v2161_v15 = vadd.f32 %v2157_v11, %v1982_v13  ;;  %v2168_v16 = vadd.f32 %v2158_v12, %v2038_v14 }
 0x7f9   :  { %v2689_v17 = vpop.f32.mrf.mxu0  ;;  %v2697_v18 = vpop.f32.mrf.mxu1 }
 0x7fa   :  { %v2360_v19 = vmul.f32 -1.442695, %v2161_v15  ;;  %v2361_v20 = vmul.f32 -1.442695, %v2168_v16 }
 0x7fb   :  { %v1985_v21 = vpop.f32.mrf.mxu0  ;;  %v2041_v0 = vpop.f32.mrf.mxu1 }
 0x7fc   :  { %2916 = vpow2.f32 %v2360_v19 }
 0x7fd   :  { %2918 = vpow2.f32 %v2361_v20  ;;  %v2690_v22 = vpop.f32.mrf.mxu0  ;;  %v2698_v23 = vpop.f32.mrf.mxu1 }
 0x7ff   :  { %v2094_v24 = vpop.f32.mrf.mxu0  ;;  %v2150_v25 = vpop.f32.mrf.mxu1 }
 0x800   :  { %v2177_v29 = vadd.f32 %v2160_v26, %v2150_v25  ;;  %v2175_v36 = vadd.f32 %v2159_v32, %v2094_v24 }
 0x801   :  { %v2705_v27 = vpop.f32.mrf.mxu0  ;;  %v2713_v28 = vpop.f32.mrf.mxu1 }
 0x802   :  { %v2362_v35 = vmul.f32 -1.442695, %v2177_v29 }
 0x803   :  { %v2097_v30 = vpop.f32.mrf.mxu0  ;;  %v2153_v31 = vpop.f32.mrf.mxu1 }
 0x804   :  { %2920 = vpow2.f32 %v2362_v35 }
 0x805   :  { %v2706_v33 = vpop.f32.mrf.mxu0  ;;  %v2714_v34 = vpop.f32.mrf.mxu1  ;;  %2922 = vtanh.f32 %v2175_v36 }
 0x809   :  { %v2917_v37 = vpop.eup %2916 }
 0x80a   :  { %v2919_v38 = vpop.eup %2918  ;;  %v2165_v39 = vadd.f32 1.0, %v2917_v37 }
 0x80b   :  { %v2172_v40 = vadd.f32 1.0, %v2919_v38 }
 0x80c   :  { %2924 = vrcp.f32 %v2165_v39 }
 0x80d   :  { %2926 = vrcp.f32 %v2172_v40 }
 0x811   :  { %v2921_v41 = vpop.eup %2920 }
 0x812   :  { %v2923_v42 = vpop.eup %2922  ;;  %v2181_v47 = vadd.f32 1.0, %v2921_v41 }
 0x814   :  { %2928 = vrcp.f32 %v2181_v47 }
 0x819   :  { %v2925_v43 = vpop.eup %2924 }
 0x81a   :  { %v2927_v44 = vpop.eup %2926  ;;  %v2185_v46 = vmul.f32 %v2925_v43, %v2923_v42 }
 0x81b   :  { %v2184_v48 = vmul.f32 %v2927_v44, %v1927_v45 }
 0x81d   :  { %v2186_v49 = vadd.f32 %v2185_v46, %v2184_v48 }
 0x81f   :  { %2930 = vtanh.f32 %v2186_v49  ;;  %2190 = vst.msk [vmem:[#allocation3] sm:$0x3] %vm45_vm0, %v2186_v49 }
 0x821   :  { %v2929_v51 = vpop.eup %2928 }
 0x826   :  { %v2196_v50 = vld [vmem:[#allocation3] sm:$0x3] }
 0x827   :  { %2197 = vst.msk [vmem:[#allocation12] sm:$0x3] %vm45_vm0, %v2196_v50 }
 0x82c   :  { %v2931_v52 = vpop.eup %2930 }
 0x82d   :  { %v2188_v53 = vmul.f32 %v2931_v52, %v2929_v51 }
 0x82f   :  { %2932 = vtanh.f32 %v2188_v53  ;;  %2189 = vst.msk [vmem:[#allocation2] sm:$0x3] %vm45_vm0, %v2188_v53 }
 0x836   :  { %v2194_v54 = vld [vmem:[#allocation2] sm:$0x3] }
 0x837   :  { %2195 = vst.msk [vmem:[#allocation10] sm:$0x3] %vm45_vm0, %v2194_v54 }
 0x838   :  { %2985 = shalt.err (!%p2982_p0)
}
 0x839   :  { %2219 = dma.vmem_to_hbm [thread:$0]  %s2217_s1, 32, %s3292_s3, [#allocation11]  }
 0x83a   :  { %s2994_s10 = scalar_lea.vmem %s2227_s30, 32  ;;  %p2999_p2 = scmp.lt.s32.totalorder %s2227_s30, %s2227_s30 }
 0x83b   :  { %p2995_p1 = scmp.ne.s32.totalorder %s2227_s30, %s2994_s10  ;;  %p3000_p3 = scmp.lt.s32.totalorder %s2994_s10, %s2994_s10 }
 0x83d   :  { %p3001_p4 = por %p3000_p3, %p2999_p2 }
 0x83f   :  { %p3002_p5 = pnand %p3001_p4, %p2995_p1 }
 0x841   :  { %3005 = shalt.err (!%p3002_p5)
}
 0x842   :  { %2229 = dma.vmem_to_hbm [thread:$0]  %s2227_s30, 32, %s3293_s4, [#allocation11]   ;;  %v2933_v55 = vpop.eup %2932 }
 0x843   :  { %2193 = vst.msk [vmem:[#allocation9 + $0xe] sm:$0x3] %vm45_vm0, %v2933_v55  ;;  %s3014_s13 = scalar_lea.vmem %s2204_s6, 256  ;;  %p3019_p7 = scmp.lt.s32.totalorder %s2204_s6, %s2204_s6 }
 0x844   :  { %p3015_p6 = scmp.ne.s32.totalorder %s2204_s6, %s3014_s13  ;;  %p3020_p8 = scmp.lt.s32.totalorder %s3014_s13, %s3014_s13 }
 0x846   :  { %p3021_p9 = por %p3020_p8, %p3019_p7 }
 0x848   :  { %p3022_p10 = pnand %p3021_p9, %p3015_p6 }
 0x84a   :  { %3025 = shalt.err (!%p3022_p10)
}
 0x84b   :  { %2209 = dma.vmem_to_hbm [thread:$0]  %s2204_s6, 256, %s3291_s2, [#allocation6], %s3043_s18, %s3043_s18, %s3044_s19  }
 0x84c   :  { %3038 = dma.done.wait [#allocation6], 256  }
 0x84d   :  { %3039 = vsyncadd [#allocation6], 4294967040 }
 0x84e   :  { %3040 = dma.done.wait [#allocation11], 64  }
 0x84f   :  { %3041 = vsyncadd [#allocation11], 4294967232 }
 0x850   :  { %2239 = vsyncpa [#allocation5], 1 }
 0x851   :  { %2240 = vsyncpa [#allocation8], 1 }
 0x852   :  { %2241 = vsyncpa [#allocation6], 1 }
 0x853   :  { %2242 = vsyncpa [#allocation11], 1 }

</bundles_post_ra>
